<compile_context>
chip_gen: v5e
topology: v5e:2x2
jax: 0.10.0
libtpu: 0.0.40
codegen_flags: <defaults>
</compile_context>

<pallas_src>
import functools

import jax
import jax.numpy as jnp
from jax.experimental import pallas as pl
from jax.experimental.pallas import tpu as pltpu

LAYER_DIMS = [784, 512, 256, 128, 64, 32, 10]   # true (PyTorch) dims
PAD_DIMS = [784, 512, 256, 128, 128, 128, 128]  # lane-dense padded dims
NUM_CLASSES = LAYER_DIMS[-1]
OUT_PAD = PAD_DIMS[-1]      # lane-dense output width (logits padded 10 -> 128)
MAX_BM = 512                # batch-tile cap (fits all generations' VMEM)
_NEG = -1e30                # finite "-inf" for masked logit columns


def _round_up(x, m):
    return (x + m - 1) // m * m


def _pick_bm(n):
    """Batch tile: big enough to amortize per-step overhead, but keep the grid
    >= 2 steps whenever possible so v7x megacore gets both TensorCores busy."""
    if n <= 8:
        return 8
    return min(MAX_BM, _round_up(pl.cdiv(n, 2), 8))


def dnnet_kernel(x_ref, *refs, compute_dtype):
    """refs = (w1, b1, ..., w6, b6, out_ref).

    Matmul operands are `compute_dtype` (bf16 fast path / f32 exact path);
    accumulation, bias add, ReLU and log_softmax are always f32.
    """
    out_ref = refs[-1]
    wb = refs[:-1]

    def dense(h, w_ref, b_ref):
        # Weights are already pre-cast in the wrapper; only the activation
        # (recomputed each layer) needs a cast here.
        return jnp.dot(h.astype(compute_dtype), w_ref[...],
                       preferred_element_type=jnp.float32) + b_ref[...]

    h = x_ref[...]                                   # compute_dtype (wrapper cast)
    for li in range(5):                              # fc1..fc5 with ReLU (f32)
        h = jnp.maximum(dense(h, wb[2 * li], wb[2 * li + 1]), 0.0)

    # fc6 into a lane-dense (BM, 128) slab; padded weight/bias columns are zero.
    logits = dense(h, wb[10], wb[11])

    # Mask padded columns so they don't perturb the softmax.
    col = jax.lax.broadcasted_iota(jnp.int32, logits.shape, 1)
    logits = jnp.where(col < NUM_CLASSES, logits, _NEG)

    # Numerically-stable log_softmax along dim=1 (f32).
    m = jnp.max(logits, axis=1, keepdims=True)
    shifted = logits - m
    lse = jnp.log(jnp.sum(jnp.exp(shifted), axis=1, keepdims=True))
    out_ref[...] = shifted - lse


def dnnet_forward(x, params, *, bf16_matmul=True):
    """x: (N, 1, 28, 28) or (N, 784). Returns (N, 10) log-probabilities."""
    compute_dtype = jnp.bfloat16 if bf16_matmul else jnp.float32
    dsize = 2 if bf16_matmul else 4

    # x.float().view(-1, 784), then (optionally) bf16 for the MXU / halved DMA.
    x = x.astype(jnp.float32).reshape(-1, LAYER_DIMS[0]).astype(compute_dtype)
    n = x.shape[0]

    bm = _pick_bm(n)
    grid = (pl.cdiv(n, bm),)          # partial tail block instead of padding x

    in_specs = [pl.BlockSpec((bm, LAYER_DIMS[0]), lambda i: (i, 0))]
    flat_params = []
    for li in range(6):
        din, dout = LAYER_DIMS[li], LAYER_DIMS[li + 1]
        din_p, dout_p = PAD_DIMS[li], PAD_DIMS[li + 1]
        w, b = params[li]                                  # w: (din, dout)
        # Zero-pad to lane-dense (8,128)-friendly tiles; pre-cast weights once
        # in the wrapper (they stay resident across the grid). Biases stay f32.
        w = jnp.pad(w, ((0, din_p - din), (0, dout_p - dout))).astype(compute_dtype)
        b = jnp.pad(b.reshape(1, dout), ((0, 0), (0, dout_p - dout))).astype(jnp.float32)
        flat_params.append(w)                              # (din_p, dout_p)
        flat_params.append(b)                              # (1, dout_p)
        # Whole-weight blocks, constant index_map -> fetched once, stay resident.
        in_specs.append(pl.BlockSpec((din_p, dout_p), lambda i: (0, 0)))
        in_specs.append(pl.BlockSpec((1, dout_p), lambda i: (0, 0)))

    rows = grid[0] * bm
    macs_per_row = sum(PAD_DIMS[i] * PAD_DIMS[i + 1] for i in range(6))
    weight_bytes = sum(dsize * PAD_DIMS[i] * PAD_DIMS[i + 1] + 4 * PAD_DIMS[i + 1]
                       for i in range(6))
    cost = pl.CostEstimate(
        flops=2 * macs_per_row * rows,
        transcendentals=(OUT_PAD + 1) * rows,              # exp + log per row
        bytes_accessed=rows * (dsize * LAYER_DIMS[0] + 4 * OUT_PAD) + weight_bytes,
    )

    out = pl.pallas_call(
        functools.partial(dnnet_kernel, compute_dtype=compute_dtype),
        out_shape=jax.ShapeDtypeStruct((n, OUT_PAD), jnp.float32),
        grid_spec=pltpu.PrefetchScalarGridSpec(
            num_scalar_prefetch=0,
            grid=grid,
            in_specs=in_specs,
            out_specs=pl.BlockSpec((bm, OUT_PAD), lambda i: (i, 0)),
        ),
        compiler_params=pltpu.CompilerParams(
            dimension_semantics=("parallel",),
            vmem_limit_bytes=32 * 1024 * 1024,   # safe on v7x (64 MiB physical)
        ),
        cost_estimate=cost,
    )(x, *flat_params)

    return out[:, :NUM_CLASSES]


def init_params(key):
    """Deterministic parameter init (shapes from DNNet.__init__)."""
    params = []
    for li in range(6):
        din, dout = LAYER_DIMS[li], LAYER_DIMS[li + 1]
        key, kw, kb = jax.random.split(key, 3)
        bound = 1.0 / jnp.sqrt(din)
        # Stored as (in, out): kernel computes x @ W + b.
        w = jax.random.uniform(kw, (din, dout), jnp.float32, -bound, bound)
        b = jax.random.uniform(kb, (dout,), jnp.float32, -bound, bound)
        params.append((w, b))
    return params


def dnnet_reference(x, params):
    """Pure-JAX f32 reference of the PyTorch forward pass."""
    h = x.astype(jnp.float32).reshape(-1, LAYER_DIMS[0])
    for li in range(5):
        w, b = params[li]
        h = jax.nn.relu(h @ w + b)
    w, b = params[5]
    logits = h @ w + b
    return jax.nn.log_softmax(logits, axis=1)


if __name__ == "__main__":
    key = jax.random.PRNGKey(0)
    key, kx, kx2 = jax.random.split(key, 3)
    params = init_params(key)

    # Small MNIST-like batch: (N=2, C=1, H=28, W=28) -> flattened to (2, 784).
    x = jax.random.normal(kx, (2, 1, 28, 28), jnp.float32)
    ref = dnnet_reference(x, params)

    # Exact f32 path preserves PyTorch semantics to tight tolerance.
    out_f32 = jax.block_until_ready(dnnet_forward(x, params, bf16_matmul=False))
    assert out_f32.shape == (2, 10), out_f32.shape
    assert jnp.allclose(out_f32, ref, atol=1e-4, rtol=1e-4), "f32 mismatch vs reference"

    # Default fast path: bf16 MXU operands, f32 accumulation/elementwise.
    out_bf = jax.block_until_ready(dnnet_forward(x, params))
    assert out_bf.shape == (2, 10), out_bf.shape
    assert jnp.allclose(out_bf, ref, atol=2e-2, rtol=2e-2), "bf16 mismatch vs reference"

    # Larger batch exercising a multi-step grid and a partial tail block
    # (bm = 152, grid = 2, no wrapper-side padding copy of x).
    x2 = jax.random.normal(kx2, (300, 1, 28, 28), jnp.float32)
    ref2 = dnnet_reference(x2, params)
    out2_f32 = jax.block_until_ready(dnnet_forward(x2, params, bf16_matmul=False))
    assert out2_f32.shape == (300, 10), out2_f32.shape
    assert jnp.allclose(out2_f32, ref2, atol=1e-4, rtol=1e-4), "f32 mismatch (big batch)"
    out2_bf = jax.block_until_ready(dnnet_forward(x2, params))
    assert out2_bf.shape == (300, 10), out2_bf.shape
    assert jnp.allclose(out2_bf, ref2, atol=2e-2, rtol=2e-2), "bf16 mismatch (big batch)"

    print("KERNEL_OK")
</pallas_src>

<mosaic_0001>
module attributes {stable_mosaic.version = 11 : i64} {
  func.func @dnnet_kernel(%arg0: i32, %arg1: memref<8x784xf32, #tpu.memory_space<vmem>>, %arg2: memref<784x512xf32, #tpu.memory_space<vmem>>, %arg3: memref<1x512xf32, #tpu.memory_space<vmem>>, %arg4: memref<512x256xf32, #tpu.memory_space<vmem>>, %arg5: memref<1x256xf32, #tpu.memory_space<vmem>>, %arg6: memref<256x128xf32, #tpu.memory_space<vmem>>, %arg7: memref<1x128xf32, #tpu.memory_space<vmem>>, %arg8: memref<128x128xf32, #tpu.memory_space<vmem>>, %arg9: memref<1x128xf32, #tpu.memory_space<vmem>>, %arg10: memref<128x128xf32, #tpu.memory_space<vmem>>, %arg11: memref<1x128xf32, #tpu.memory_space<vmem>>, %arg12: memref<128x128xf32, #tpu.memory_space<vmem>>, %arg13: memref<1x128xf32, #tpu.memory_space<vmem>>, %arg14: memref<8x128xf32, #tpu.memory_space<vmem>>) attributes {dimension_semantics = [#tpu.dimension_semantics<parallel>], iteration_bounds = array<i64: 1>, scalar_prefetch = 0 : i64, scratch_operands = 0 : i64, tpu.core_type = #tpu.core_type<tc>, window_params = [{transform_indices = @transform_0, window_bounds = array<i64: 8, 784>}, {pipeline_mode = #tpu.pipeline_mode<synchronous>, transform_indices = @transform_1, window_bounds = array<i64: 784, 512>}, {pipeline_mode = #tpu.pipeline_mode<synchronous>, transform_indices = @transform_2, window_bounds = array<i64: 1, 512>}, {pipeline_mode = #tpu.pipeline_mode<synchronous>, transform_indices = @transform_3, window_bounds = array<i64: 512, 256>}, {pipeline_mode = #tpu.pipeline_mode<synchronous>, transform_indices = @transform_4, window_bounds = array<i64: 1, 256>}, {pipeline_mode = #tpu.pipeline_mode<synchronous>, transform_indices = @transform_5, window_bounds = array<i64: 256, 128>}, {pipeline_mode = #tpu.pipeline_mode<synchronous>, transform_indices = @transform_6, window_bounds = array<i64: 1, 128>}, {pipeline_mode = #tpu.pipeline_mode<synchronous>, transform_indices = @transform_7, window_bounds = array<i64: 128, 128>}, {pipeline_mode = #tpu.pipeline_mode<synchronous>, transform_indices = @transform_8, window_bounds = array<i64: 1, 128>}, {pipeline_mode = #tpu.pipeline_mode<synchronous>, transform_indices = @transform_9, window_bounds = array<i64: 128, 128>}, {pipeline_mode = #tpu.pipeline_mode<synchronous>, transform_indices = @transform_10, window_bounds = array<i64: 1, 128>}, {pipeline_mode = #tpu.pipeline_mode<synchronous>, transform_indices = @transform_11, window_bounds = array<i64: 128, 128>}, {pipeline_mode = #tpu.pipeline_mode<synchronous>, transform_indices = @transform_12, window_bounds = array<i64: 1, 128>}, {transform_indices = @transform_13, window_bounds = array<i64: 8, 128>}]} {
    %c0 = arith.constant 0 : index
    %c0_0 = arith.constant 0 : index
    %0 = vector.load %arg1[%c0, %c0_0] : memref<8x784xf32, #tpu.memory_space<vmem>>, vector<8x784xf32>
    %c0_1 = arith.constant 0 : index
    %c0_2 = arith.constant 0 : index
    %1 = vector.load %arg2[%c0_1, %c0_2] : memref<784x512xf32, #tpu.memory_space<vmem>>, vector<784x512xf32>
    %cst = arith.constant dense<0.000000e+00> : vector<8x512xf32>
    %2 = tpu.matmul %0, %1, %cst {dimension_numbers = #tpu.dot_dimension_numbers<[1], [0], [0], [1], [0, 0, 1, 1], [], []>} : vector<8x784xf32>, vector<784x512xf32>, vector<8x512xf32> -> vector<8x512xf32>
    %c0_3 = arith.constant 0 : index
    %c0_4 = arith.constant 0 : index
    %3 = vector.load %arg3[%c0_3, %c0_4] : memref<1x512xf32, #tpu.memory_space<vmem>>, vector<1x512xf32>
    %4 = vector.broadcast %3 : vector<1x512xf32> to vector<8x512xf32>
    %5 = arith.addf %2, %4 : vector<8x512xf32>
    %cst_5 = arith.constant 0.000000e+00 : f32
    %6 = vector.broadcast %cst_5 : f32 to vector<8x512xf32>
    %7 = arith.maximumf %5, %6 : vector<8x512xf32>
    %c0_6 = arith.constant 0 : index
    %c0_7 = arith.constant 0 : index
    %8 = vector.load %arg4[%c0_6, %c0_7] : memref<512x256xf32, #tpu.memory_space<vmem>>, vector<512x256xf32>
    %cst_8 = arith.constant dense<0.000000e+00> : vector<8x256xf32>
    %9 = tpu.matmul %7, %8, %cst_8 {dimension_numbers = #tpu.dot_dimension_numbers<[1], [0], [0], [1], [0, 0, 1, 1], [], []>} : vector<8x512xf32>, vector<512x256xf32>, vector<8x256xf32> -> vector<8x256xf32>
    %c0_9 = arith.constant 0 : index
    %c0_10 = arith.constant 0 : index
    %10 = vector.load %arg5[%c0_9, %c0_10] : memref<1x256xf32, #tpu.memory_space<vmem>>, vector<1x256xf32>
    %11 = vector.broadcast %10 : vector<1x256xf32> to vector<8x256xf32>
    %12 = arith.addf %9, %11 : vector<8x256xf32>
    %cst_11 = arith.constant 0.000000e+00 : f32
    %13 = vector.broadcast %cst_11 : f32 to vector<8x256xf32>
    %14 = arith.maximumf %12, %13 : vector<8x256xf32>
    %c0_12 = arith.constant 0 : index
    %c0_13 = arith.constant 0 : index
    %15 = vector.load %arg6[%c0_12, %c0_13] : memref<256x128xf32, #tpu.memory_space<vmem>>, vector<256x128xf32>
    %cst_14 = arith.constant dense<0.000000e+00> : vector<8x128xf32>
    %16 = tpu.matmul %14, %15, %cst_14 {dimension_numbers = #tpu.dot_dimension_numbers<[1], [0], [0], [1], [0, 0, 1, 1], [], []>} : vector<8x256xf32>, vector<256x128xf32>, vector<8x128xf32> -> vector<8x128xf32>
    %c0_15 = arith.constant 0 : index
    %c0_16 = arith.constant 0 : index
    %17 = vector.load %arg7[%c0_15, %c0_16] : memref<1x128xf32, #tpu.memory_space<vmem>>, vector<1x128xf32>
    %18 = vector.broadcast %17 : vector<1x128xf32> to vector<8x128xf32>
    %19 = arith.addf %16, %18 : vector<8x128xf32>
    %cst_17 = arith.constant 0.000000e+00 : f32
    %20 = vector.broadcast %cst_17 : f32 to vector<8x128xf32>
    %21 = arith.maximumf %19, %20 : vector<8x128xf32>
    %c0_18 = arith.constant 0 : index
    %c0_19 = arith.constant 0 : index
    %22 = vector.load %arg8[%c0_18, %c0_19] : memref<128x128xf32, #tpu.memory_space<vmem>>, vector<128x128xf32>
    %cst_20 = arith.constant dense<0.000000e+00> : vector<8x128xf32>
    %23 = tpu.matmul %21, %22, %cst_20 {dimension_numbers = #tpu.dot_dimension_numbers<[1], [0], [0], [1], [0, 0, 1, 1], [], []>} : vector<8x128xf32>, vector<128x128xf32>, vector<8x128xf32> -> vector<8x128xf32>
    %c0_21 = arith.constant 0 : index
    %c0_22 = arith.constant 0 : index
    %24 = vector.load %arg9[%c0_21, %c0_22] : memref<1x128xf32, #tpu.memory_space<vmem>>, vector<1x128xf32>
    %25 = vector.broadcast %24 : vector<1x128xf32> to vector<8x128xf32>
    %26 = arith.addf %23, %25 : vector<8x128xf32>
    %cst_23 = arith.constant 0.000000e+00 : f32
    %27 = vector.broadcast %cst_23 : f32 to vector<8x128xf32>
    %28 = arith.maximumf %26, %27 : vector<8x128xf32>
    %c0_24 = arith.constant 0 : index
    %c0_25 = arith.constant 0 : index
    %29 = vector.load %arg10[%c0_24, %c0_25] : memref<128x128xf32, #tpu.memory_space<vmem>>, vector<128x128xf32>
    %cst_26 = arith.constant dense<0.000000e+00> : vector<8x128xf32>
    %30 = tpu.matmul %28, %29, %cst_26 {dimension_numbers = #tpu.dot_dimension_numbers<[1], [0], [0], [1], [0, 0, 1, 1], [], []>} : vector<8x128xf32>, vector<128x128xf32>, vector<8x128xf32> -> vector<8x128xf32>
    %c0_27 = arith.constant 0 : index
    %c0_28 = arith.constant 0 : index
    %31 = vector.load %arg11[%c0_27, %c0_28] : memref<1x128xf32, #tpu.memory_space<vmem>>, vector<1x128xf32>
    %32 = vector.broadcast %31 : vector<1x128xf32> to vector<8x128xf32>
    %33 = arith.addf %30, %32 : vector<8x128xf32>
    %cst_29 = arith.constant 0.000000e+00 : f32
    %34 = vector.broadcast %cst_29 : f32 to vector<8x128xf32>
    %35 = arith.maximumf %33, %34 : vector<8x128xf32>
    %c0_30 = arith.constant 0 : index
    %c0_31 = arith.constant 0 : index
    %36 = vector.load %arg12[%c0_30, %c0_31] : memref<128x128xf32, #tpu.memory_space<vmem>>, vector<128x128xf32>
    %cst_32 = arith.constant dense<0.000000e+00> : vector<8x128xf32>
    %37 = tpu.matmul %35, %36, %cst_32 {dimension_numbers = #tpu.dot_dimension_numbers<[1], [0], [0], [1], [0, 0, 1, 1], [], []>} : vector<8x128xf32>, vector<128x128xf32>, vector<8x128xf32> -> vector<8x128xf32>
    %c0_33 = arith.constant 0 : index
    %c0_34 = arith.constant 0 : index
    %38 = vector.load %arg13[%c0_33, %c0_34] : memref<1x128xf32, #tpu.memory_space<vmem>>, vector<1x128xf32>
    %39 = vector.broadcast %38 : vector<1x128xf32> to vector<8x128xf32>
    %40 = arith.addf %37, %39 : vector<8x128xf32>
    %41 = tpu.iota {dimensions = array<i32: 1>} : vector<8x128xi32>
    %c10_i32 = arith.constant 10 : i32
    %42 = vector.broadcast %c10_i32 : i32 to vector<8x128xi32>
    %43 = arith.cmpi slt, %41, %42 : vector<8x128xi32>
    %cst_35 = arith.constant -1.000000e+30 : f32
    %44 = vector.broadcast %cst_35 : f32 to vector<8x128xf32>
    %45 = arith.select %43, %40, %44 : vector<8x128xi1>, vector<8x128xf32>
    %cst_36 = arith.constant dense<0xFF800000> : vector<8xf32>
    %46 = vector.multi_reduction <maximumf>, %45, %cst_36 [1] : vector<8x128xf32> to vector<8xf32>
    %47 = vector.shape_cast %46 : vector<8xf32> to vector<8x1xf32>
    %48 = vector.broadcast %47 : vector<8x1xf32> to vector<8x128xf32>
    %49 = arith.subf %45, %48 : vector<8x128xf32>
    %50 = math.exp %49 : vector<8x128xf32>
    %cst_37 = arith.constant dense<0.000000e+00> : vector<8xf32>
    %51 = vector.multi_reduction <add>, %50, %cst_37 [1] : vector<8x128xf32> to vector<8xf32>
    %52 = vector.shape_cast %51 : vector<8xf32> to vector<8x1xf32>
    %53 = math.log %52 : vector<8x1xf32>
    %54 = vector.broadcast %53 : vector<8x1xf32> to vector<8x128xf32>
    %55 = arith.subf %49, %54 : vector<8x128xf32>
    %c0_38 = arith.constant 0 : index
    %c0_39 = arith.constant 0 : index
    %56 = vector.load %arg14[%c0_38, %c0_39] : memref<8x128xf32, #tpu.memory_space<vmem>>, vector<8x128xf32>
    tpu.vector_store %arg14[%c0_38, %c0_39], %55 {strides = array<i32>} : memref<8x128xf32, #tpu.memory_space<vmem>>, vector<8x128xf32>,
    return
  }
  func.func @transform_0(%arg0: i32) -> (i32, i32) {
    %c0_i32 = arith.constant 0 : i32
    %c0_i32_0 = arith.constant 0 : i32
    return %arg0, %c0_i32 : i32, i32
  }
  func.func @transform_1(%arg0: i32) -> (i32, i32) {
    %c0_i32 = arith.constant 0 : i32
    %c0_i32_0 = arith.constant 0 : i32
    %c0_i32_1 = arith.constant 0 : i32
    return %c0_i32, %c0_i32_0 : i32, i32
  }
  func.func @transform_2(%arg0: i32) -> (i32, i32) {
    %c0_i32 = arith.constant 0 : i32
    %c0_i32_0 = arith.constant 0 : i32
    %c0_i32_1 = arith.constant 0 : i32
    return %c0_i32, %c0_i32_0 : i32, i32
  }
  func.func @transform_3(%arg0: i32) -> (i32, i32) {
    %c0_i32 = arith.constant 0 : i32
    %c0_i32_0 = arith.constant 0 : i32
    %c0_i32_1 = arith.constant 0 : i32
    return %c0_i32, %c0_i32_0 : i32, i32
  }
  func.func @transform_4(%arg0: i32) -> (i32, i32) {
    %c0_i32 = arith.constant 0 : i32
    %c0_i32_0 = arith.constant 0 : i32
    %c0_i32_1 = arith.constant 0 : i32
    return %c0_i32, %c0_i32_0 : i32, i32
  }
  func.func @transform_5(%arg0: i32) -> (i32, i32) {
    %c0_i32 = arith.constant 0 : i32
    %c0_i32_0 = arith.constant 0 : i32
    %c0_i32_1 = arith.constant 0 : i32
    return %c0_i32, %c0_i32_0 : i32, i32
  }
  func.func @transform_6(%arg0: i32) -> (i32, i32) {
    %c0_i32 = arith.constant 0 : i32
    %c0_i32_0 = arith.constant 0 : i32
    %c0_i32_1 = arith.constant 0 : i32
    return %c0_i32, %c0_i32_0 : i32, i32
  }
  func.func @transform_7(%arg0: i32) -> (i32, i32) {
    %c0_i32 = arith.constant 0 : i32
    %c0_i32_0 = arith.constant 0 : i32
    %c0_i32_1 = arith.constant 0 : i32
    return %c0_i32, %c0_i32_0 : i32, i32
  }
  func.func @transform_8(%arg0: i32) -> (i32, i32) {
    %c0_i32 = arith.constant 0 : i32
    %c0_i32_0 = arith.constant 0 : i32
    %c0_i32_1 = arith.constant 0 : i32
    return %c0_i32, %c0_i32_0 : i32, i32
  }
  func.func @transform_9(%arg0: i32) -> (i32, i32) {
    %c0_i32 = arith.constant 0 : i32
    %c0_i32_0 = arith.constant 0 : i32
    %c0_i32_1 = arith.constant 0 : i32
    return %c0_i32, %c0_i32_0 : i32, i32
  }
  func.func @transform_10(%arg0: i32) -> (i32, i32) {
    %c0_i32 = arith.constant 0 : i32
    %c0_i32_0 = arith.constant 0 : i32
    %c0_i32_1 = arith.constant 0 : i32
    return %c0_i32, %c0_i32_0 : i32, i32
  }
  func.func @transform_11(%arg0: i32) -> (i32, i32) {
    %c0_i32 = arith.constant 0 : i32
    %c0_i32_0 = arith.constant 0 : i32
    %c0_i32_1 = arith.constant 0 : i32
    return %c0_i32, %c0_i32_0 : i32, i32
  }
  func.func @transform_12(%arg0: i32) -> (i32, i32) {
    %c0_i32 = arith.constant 0 : i32
    %c0_i32_0 = arith.constant 0 : i32
    %c0_i32_1 = arith.constant 0 : i32
    return %c0_i32, %c0_i32_0 : i32, i32
  }
  func.func @transform_13(%arg0: i32) -> (i32, i32) {
    %c0_i32 = arith.constant 0 : i32
    %c0_i32_0 = arith.constant 0 : i32
    return %arg0, %c0_i32 : i32, i32
  }
}

</mosaic_0001>

<bundles_post_ra>
// kernel: tpu_custom_call.1
= control target key start
LH: loop header
LB: loop body
LE: loop exit
PB: predicated region body
PF: predicated region fallthrough
CT: control target
= control target key end

     0   :  { %18 = vsyncpa [#allocation3], 0  ;;  %s2374_s0 = inlined_call_operand.hbm [shape: f32[2,784], index: 0, kind: input, shape index: {}]   ;;  %s2375_s1 = inlined_call_operand.hbm [shape: f32[784,512], index: 1, kind: input, shape index: {}]   ;;  %s2376_s2 = inlined_call_operand.hbm [shape: f32[1,512], index: 2, kind: input, shape index: {}]   ;;  %s2377_s3 = inlined_call_operand.hbm [shape: f32[512,256], index: 3, kind: input, shape index: {}]   ;;  %s2378_s4 = inlined_call_operand.hbm [shape: f32[1,256], index: 4, kind: input, shape index: {}]   ;;  %s2379_s5 = inlined_call_operand.hbm [shape: f32[256,128], index: 5, kind: input, shape index: {}]   ;;  %s2380_s6 = inlined_call_operand.hbm [shape: f32[1,128], index: 6, kind: input, shape index: {}]   ;;  %s2381_s7 = inlined_call_operand.hbm [shape: f32[128,128], index: 7, kind: input, shape index: {}]   ;;  %s2382_s8 = inlined_call_operand.hbm [shape: f32[1,128], index: 8, kind: input, shape index: {}]   ;;  %s2383_s9 = inlined_call_operand.hbm [shape: f32[128,128], index: 9, kind: input, shape index: {}]   ;;  %s2384_s10 = inlined_call_operand.hbm [shape: f32[1,128], index: 10, kind: input, shape index: {}]   ;;  %s2385_s11 = inlined_call_operand.hbm [shape: f32[128,128], index: 11, kind: input, shape index: {}]   ;;  %s2386_s12 = inlined_call_operand.hbm [shape: f32[1,128], index: 12, kind: input, shape index: {}]   ;;  %s2387_s13 = inlined_call_operand.hbm [shape: f32[2,128], index: 13, kind: output, shape index: {}]  }
   0x1   :  { %19 = vsyncpa [#allocation6], 0 }
   0x2   :  { %20 = vsyncpa [#allocation9], 0 }
   0x3   :  { %21 = vsyncpa [#allocation12], 0 }
   0x4   :  { %22 = vsyncpa [#allocation15], 0 }
   0x5   :  { %23 = vsyncpa [#allocation18], 0 }
   0x6   :  { %24 = vsyncpa [#allocation21], 0 }
   0x7   :  { %25 = vsyncpa [#allocation4], 0  ;;  %s43_s27 = sshll.u32 %s2375_s1, 4  ;;  %s44_s27 = int_to_ptr.hbm [resolvable:$true] %s43_s27 }
   0x8   :  { %29 = vsyncadd [#allocation3], 672  ;;  %s2177_s28 = smov [#allocation5]   ;;  %s67_s15 = sshll.u32 %s2377_s3, 4  ;;  %s68_s15 = int_to_ptr.hbm [resolvable:$true] %s67_s15 }
   0x9   :  { %s45_s29 = sshll.u32 %s2177_s28, 4  ;;  %s2178_s16 = smov 512   ;;  %s46_s29 = int_to_ptr.vmem [resolvable:$true] %s45_s29 }
   0xa   :  { %s2179_s17 = smov 32   ;;  %s2180_s18 = smov [#allocation8]  }
   0xb   :  { %51 = dma.hbm_to_vmem [thread:$0]  %s44_s27, 50176, %s46_s29, [#allocation6], %s2178_s16, %s2178_s16, %s2179_s17  }
   0xc   :  { %s69_s19 = sshll.u32 %s2180_s18, 4  ;;  %s2181_s20 = smov 256   ;;  %s70_s19 = int_to_ptr.vmem [resolvable:$true] %s69_s19 }
   0xd   :  { %s2182_s21 = smov 16   ;;  %s91_s23 = sshll.u32 %s2379_s5, 4  ;;  %s92_s23 = int_to_ptr.hbm [resolvable:$true] %s91_s23 }
   0xe   :  { %75 = dma.hbm_to_vmem [thread:$0]  %s68_s15, 16384, %s70_s19, [#allocation9], %s2181_s20, %s2181_s20, %s2182_s21  }
   0xf   :  { %s2183_s24 = smov [#allocation11]   ;;  %s115_s28 = sshll.u32 %s2381_s7, 4  ;;  %s116_s28 = int_to_ptr.hbm [resolvable:$true] %s115_s28 }
  0x10   :  { %s93_s25 = sshll.u32 %s2183_s24, 4  ;;  %s2184_s27 = smov 128   ;;  %s94_s25 = int_to_ptr.vmem [resolvable:$true] %s93_s25 }
  0x11   :  { %s2185_s29 = smov 8   ;;  %s2186_s30 = smov [#allocation14]  }
  0x12   :  { %99 = dma.hbm_to_vmem [thread:$0]  %s92_s23, 4096, %s94_s25, [#allocation12], %s2184_s27, %s2184_s27, %s2185_s29  }
  0x13   :  { %s117_s14 = sshll.u32 %s2186_s30, 4  ;;  %s139_s18 = sshll.u32 %s2383_s9, 4  ;;  %s118_s14 = int_to_ptr.vmem [resolvable:$true] %s117_s14  ;;  %s140_s18 = int_to_ptr.hbm [resolvable:$true] %s139_s18 }
  0x14   :  { %123 = dma.hbm_to_vmem [thread:$0]  %s116_s28, 2048, %s118_s14, [#allocation15], %s2184_s27, %s2184_s27, %s2185_s29  }
  0x15   :  { %s163_s20 = sshll.u32 %s2385_s11, 4  ;;  %s2187_s21 = smov [#allocation17]   ;;  %s164_s20 = int_to_ptr.hbm [resolvable:$true] %s163_s20 }
  0x16   :  { %s141_s1 = sshll.u32 %s2187_s21, 4  ;;  %s2188_s7 = smov [#allocation20]   ;;  %s142_s1 = int_to_ptr.vmem [resolvable:$true] %s141_s1 }
  0x17   :  { %147 = dma.hbm_to_vmem [thread:$0]  %s140_s18, 2048, %s142_s1, [#allocation18], %s2184_s27, %s2184_s27, %s2185_s29  }
  0x18   :  { %s165_s22 = sshll.u32 %s2188_s7, 4  ;;  %s30_s25 = sshll.u32 %s2374_s0, 4  ;;  %s166_s22 = int_to_ptr.vmem [resolvable:$true] %s165_s22  ;;  %s31_s25 = int_to_ptr.hbm [resolvable:$true] %s30_s25 }
  0x19   :  { %171 = dma.hbm_to_vmem [thread:$0]  %s164_s20, 2048, %s166_s22, [#allocation21], %s2184_s27, %s2184_s27, %s2185_s29  }
  0x1a   :  { %s2189_s9 = smov [#allocation2]   ;;  %s57_s11 = sshll.u32 %s2376_s2, 4  ;;  %s58_s11 = int_to_ptr.hbm [resolvable:$true] %s57_s11 }
  0x1b   :  { %s32_s3 = sshll.u32 %s2189_s9, 4  ;;  %s2190_s30 = smov 224   ;;  %s33_s3 = int_to_ptr.vmem [resolvable:$true] %s32_s3 }
  0x1c   :  { %s2191_s14 = smov 14   ;;  %s2192_s16 = smov [#allocation7]  }
  0x1d   :  { %38 = dma.hbm_to_vmem [thread:$0]  %s31_s25, 224, %s33_s3, [#allocation3], %s2190_s30, %s2190_s30, %s2191_s14  }
  0x1e   :  { %s59_s15 = sshll.u32 %s2192_s16, 4  ;;  %s81_s0 = sshll.u32 %s2378_s4, 4  ;;  %s60_s15 = int_to_ptr.vmem [resolvable:$true] %s59_s15  ;;  %s82_s0 = int_to_ptr.hbm [resolvable:$true] %s81_s0 }
  0x1f   :  { %62 = dma.hbm_to_vmem [thread:$0]  %s58_s11, 64, %s60_s15, [#allocation6]  }
  0x20   :  { %s105_s19 = sshll.u32 %s2380_s6, 4  ;;  %s2193_s20 = smov [#allocation10]   ;;  %s106_s19 = int_to_ptr.hbm [resolvable:$true] %s105_s19 }
  0x21   :  { %s83_s21 = sshll.u32 %s2193_s20, 4  ;;  %s2194_s2 = smov [#allocation13]   ;;  %s84_s21 = int_to_ptr.vmem [resolvable:$true] %s83_s21 }
  0x22   :  { %86 = dma.hbm_to_vmem [thread:$0]  %s82_s0, 32, %s84_s21, [#allocation9]  }
  0x23   :  { %s107_s1 = sshll.u32 %s2194_s2, 4  ;;  %s129_s23 = sshll.u32 %s2382_s8, 4  ;;  %s108_s1 = int_to_ptr.vmem [resolvable:$true] %s107_s1  ;;  %s130_s23 = int_to_ptr.hbm [resolvable:$true] %s129_s23 }
  0x24   :  { %110 = dma.hbm_to_vmem [thread:$0]  %s106_s19, 16, %s108_s1, [#allocation12]  }
  0x25   :  { %s153_s25 = sshll.u32 %s2384_s10, 4  ;;  %s2195_s9 = smov [#allocation16]   ;;  %s154_s25 = int_to_ptr.hbm [resolvable:$true] %s153_s25 }
  0x26   :  { %s131_s6 = sshll.u32 %s2195_s9, 4  ;;  %s2196_s3 = smov [#allocation19]   ;;  %s132_s6 = int_to_ptr.vmem [resolvable:$true] %s131_s6 }
  0x27   :  { %134 = dma.hbm_to_vmem [thread:$0]  %s130_s23, 16, %s132_s6, [#allocation15]  }
  0x28   :  { %s155_s26 = sshll.u32 %s2196_s3, 4  ;;  %s177_s30 = sshll.u32 %s2386_s12, 4  ;;  %s156_s26 = int_to_ptr.vmem [resolvable:$true] %s155_s26  ;;  %s178_s30 = int_to_ptr.hbm [resolvable:$true] %s177_s30 }
  0x29   :  { %158 = dma.hbm_to_vmem [thread:$0]  %s154_s25, 16, %s156_s26, [#allocation18]  }
  0x2a   :  { %s2197_s8 = smov [#allocation22]  }
  0x2b   :  { %s179_s14 = sshll.u32 %s2197_s8, 4  ;;  %s180_s14 = int_to_ptr.vmem [resolvable:$true] %s179_s14 }
  0x2c   :  { %182 = dma.hbm_to_vmem [thread:$0]  %s178_s30, 16, %s180_s14, [#allocation21]  }
  0x2d   :  { %2161 = dma.done.wait [#allocation3], 896  }
  0x2e   :  { %2162 = vsyncadd [#allocation3], 4294966400 }
  0x2f   :  { %2163 = dma.done.wait [#allocation6], 50240  }
  0x30   :  { %2164 = vsyncadd [#allocation6], 4294917056 }
  0x31   :  { %2165 = dma.done.wait [#allocation9], 16416  }
  0x32   :  { %2166 = vsyncadd [#allocation9], 4294950880 }
  0x33   :  { %2167 = dma.done.wait [#allocation12], 4112  }
  0x34   :  { %2168 = vsyncadd [#allocation12], 4294963184 }
  0x35   :  { %2169 = dma.done.wait [#allocation15], 2064  }
  0x36   :  { %2170 = vsyncadd [#allocation15], 4294965232 }
  0x37   :  { %2171 = dma.done.wait [#allocation18], 2064  }
  0x38   :  { %2172 = vsyncadd [#allocation18], 4294965232 }
  0x39   :  { %2173 = dma.done.wait [#allocation21], 2064  }
  0x3a   :  { %2174 = vsyncadd [#allocation21], 4294965232  ;;  %v303_v0 = vld [vmem:[#allocation5 + $0x1e0] sm:$0xff]  ;;  %v235_v54 = vld [vmem:[#allocation2] sm:$0xff]  ;;  %vm681_vm0 = vcmask 130048  }
  0x3b   :  { %v367_v1 = vld [vmem:[#allocation5 + $0x3e0] sm:$0xff]  ;;  %684 = vmatpush.msra.mxu0 %v303_v0  ;;  %v237_v55 = vld [vmem:[#allocation2 + $0xe] sm:$0xff]  ;;  %653 = vst [vmem:[#allocation1] ss:$4 sm:$0xff] %v235_v54 }
  0x3c   :  { %v431_v2 = vld [vmem:[#allocation5 + $0x5e0] sm:$0xff]  ;;  %704 = vmatpush.msra.mxu1 %v367_v1  ;;  %v241_v59 = vld [vmem:[#allocation2 + $0x2a] sm:$0xff]  ;;  %655 = vst [vmem:[#allocation1 + $0x1] ss:$4 sm:$0xff] %v237_v55  ;;  %v264_v55 = vld [vmem:[#allocation5 + $0xa8] sm:$0xff] }
  0x3d   :  { %v495_v3 = vld [vmem:[#allocation5 + $0x7e0] sm:$0xff]  ;;  %724 = vmatpush.msra.mxu2 %v431_v2  ;;  %659 = vst [vmem:[#allocation1 + $0x3] ss:$4 sm:$0xff] %v241_v59  ;;  %v260_v59 = vld [vmem:[#allocation5 + $0x88] sm:$0xff] }
  0x3e   :  { %v299_v4 = vld [vmem:[#allocation5 + $0x1c0] sm:$0xff]  ;;  %744 = vmatpush.msra.mxu3 %v495_v3 }
  0x3f   :  { %v363_v5 = vld [vmem:[#allocation5 + $0x3c0] sm:$0xff]  ;;  %685 = vmatpush.msra.mxu0 %v299_v4 }
  0x40   :  { %v427_v6 = vld [vmem:[#allocation5 + $0x5c0] sm:$0xff]  ;;  %705 = vmatpush.msra.mxu1 %v363_v5 }
  0x41   :  { %v491_v7 = vld [vmem:[#allocation5 + $0x7c0] sm:$0xff]  ;;  %725 = vmatpush.msra.mxu2 %v427_v6 }
  0x42   :  { %v295_v8 = vld [vmem:[#allocation5 + $0x1a0] sm:$0xff]  ;;  %745 = vmatpush.msra.mxu3 %v491_v7  ;;  %v304_v7 = vld [vmem:[#allocation5 + $0x1e8] sm:$0xff] }
  0x43   :  { %v359_v9 = vld [vmem:[#allocation5 + $0x3a0] sm:$0xff]  ;;  %686 = vmatpush.msra.mxu0 %v295_v8 }
  0x44   :  { %v423_v10 = vld [vmem:[#allocation5 + $0x5a0] sm:$0xff]  ;;  %706 = vmatpush.msra.mxu1 %v359_v9 }
  0x45   :  { %v487_v11 = vld [vmem:[#allocation5 + $0x7a0] sm:$0xff]  ;;  %726 = vmatpush.msra.mxu2 %v423_v10 }
  0x46   :  { %v291_v12 = vld [vmem:[#allocation5 + $0x180] sm:$0xff]  ;;  %746 = vmatpush.msra.mxu3 %v487_v11  ;;  %v300_v11 = vld [vmem:[#allocation5 + $0x1c8] sm:$0xff] }
  0x47   :  { %v355_v13 = vld [vmem:[#allocation5 + $0x380] sm:$0xff]  ;;  %687 = vmatpush.msra.mxu0 %v291_v12 }
  0x48   :  { %v419_v14 = vld [vmem:[#allocation5 + $0x580] sm:$0xff]  ;;  %707 = vmatpush.msra.mxu1 %v355_v13 }
  0x49   :  { %v483_v15 = vld [vmem:[#allocation5 + $0x780] sm:$0xff]  ;;  %727 = vmatpush.msra.mxu2 %v419_v14  ;;  %v368_v14 = vld [vmem:[#allocation5 + $0x3e8] sm:$0xff] }
  0x4a   :  { %v287_v16 = vld [vmem:[#allocation5 + $0x160] sm:$0xff]  ;;  %747 = vmatpush.msra.mxu3 %v483_v15 }
  0x4b   :  { %v351_v17 = vld [vmem:[#allocation5 + $0x360] sm:$0xff]  ;;  %688 = vmatpush.msra.mxu0 %v287_v16  ;;  %v296_v16 = vld [vmem:[#allocation5 + $0x1a8] sm:$0xff] }
  0x4c   :  { %v415_v18 = vld [vmem:[#allocation5 + $0x560] sm:$0xff]  ;;  %708 = vmatpush.msra.mxu1 %v351_v17 }
  0x4d   :  { %v479_v19 = vld [vmem:[#allocation5 + $0x760] sm:$0xff]  ;;  %728 = vmatpush.msra.mxu2 %v415_v18 }
  0x4e   :  { %v283_v20 = vld [vmem:[#allocation5 + $0x140] sm:$0xff]  ;;  %748 = vmatpush.msra.mxu3 %v479_v19  ;;  %v364_v19 = vld [vmem:[#allocation5 + $0x3c8] sm:$0xff] }
  0x4f   :  { %v347_v21 = vld [vmem:[#allocation5 + $0x340] sm:$0xff]  ;;  %689 = vmatpush.msra.mxu0 %v283_v20 }
  0x50   :  { %v411_v22 = vld [vmem:[#allocation5 + $0x540] sm:$0xff]  ;;  %709 = vmatpush.msra.mxu1 %v347_v21 }
  0x51   :  { %v475_v23 = vld [vmem:[#allocation5 + $0x740] sm:$0xff]  ;;  %729 = vmatpush.msra.mxu2 %v411_v22  ;;  %v292_v22 = vld [vmem:[#allocation5 + $0x188] sm:$0xff] }
  0x52   :  { %v279_v24 = vld [vmem:[#allocation5 + $0x120] sm:$0xff]  ;;  %749 = vmatpush.msra.mxu3 %v475_v23 }
  0x53   :  { %v343_v25 = vld [vmem:[#allocation5 + $0x320] sm:$0xff]  ;;  %690 = vmatpush.msra.mxu0 %v279_v24  ;;  %v360_v24 = vld [vmem:[#allocation5 + $0x3a8] sm:$0xff] }
  0x54   :  { %v407_v26 = vld [vmem:[#allocation5 + $0x520] sm:$0xff]  ;;  %710 = vmatpush.msra.mxu1 %v343_v25 }
  0x55   :  { %v471_v27 = vld [vmem:[#allocation5 + $0x720] sm:$0xff]  ;;  %730 = vmatpush.msra.mxu2 %v407_v26 }
  0x56   :  { %v275_v28 = vld [vmem:[#allocation5 + $0x100] sm:$0xff]  ;;  %750 = vmatpush.msra.mxu3 %v471_v27  ;;  %v288_v27 = vld [vmem:[#allocation5 + $0x168] sm:$0xff] }
  0x57   :  { %v339_v29 = vld [vmem:[#allocation5 + $0x300] sm:$0xff]  ;;  %691 = vmatpush.msra.mxu0 %v275_v28  ;;  %v356_v28 = vld [vmem:[#allocation5 + $0x388] sm:$0xff] }
  0x58   :  { %v403_v30 = vld [vmem:[#allocation5 + $0x500] sm:$0xff]  ;;  %711 = vmatpush.msra.mxu1 %v339_v29 }
  0x59   :  { %v467_v31 = vld [vmem:[#allocation5 + $0x700] sm:$0xff]  ;;  %731 = vmatpush.msra.mxu2 %v403_v30 }
  0x5a   :  { %v271_v32 = vld [vmem:[#allocation5 + $0xe0] sm:$0xff]  ;;  %751 = vmatpush.msra.mxu3 %v467_v31  ;;  %v284_v31 = vld [vmem:[#allocation5 + $0x148] sm:$0xff] }
  0x5b   :  { %v335_v33 = vld [vmem:[#allocation5 + $0x2e0] sm:$0xff]  ;;  %692 = vmatpush.msra.mxu0 %v271_v32  ;;  %v352_v32 = vld [vmem:[#allocation5 + $0x368] sm:$0xff] }
  0x5c   :  { %v399_v34 = vld [vmem:[#allocation5 + $0x4e0] sm:$0xff]  ;;  %712 = vmatpush.msra.mxu1 %v335_v33 }
  0x5d   :  { %v463_v35 = vld [vmem:[#allocation5 + $0x6e0] sm:$0xff]  ;;  %732 = vmatpush.msra.mxu2 %v399_v34 }
  0x5e   :  { %v267_v36 = vld [vmem:[#allocation5 + $0xc0] sm:$0xff]  ;;  %752 = vmatpush.msra.mxu3 %v463_v35  ;;  %v236_v35 = vld [vmem:[#allocation2 + $0x8] sm:$0x3f] }
  0x5f   :  { %v331_v37 = vld [vmem:[#allocation5 + $0x2c0] sm:$0xff]  ;;  %693 = vmatpush.msra.mxu0 %v267_v36  ;;  %v280_v36 = vld [vmem:[#allocation5 + $0x128] sm:$0xff]  ;;  %661 = vst [vmem:[#allocation1 + $0x20] ss:$4 sm:$0xff] %v236_v35 }
  0x60   :  { %v395_v38 = vld [vmem:[#allocation5 + $0x4c0] sm:$0xff]  ;;  %713 = vmatpush.msra.mxu1 %v331_v37  ;;  %v480_v35 = vld [vmem:[#allocation5 + $0x768] sm:$0xff] }
  0x61   :  { %v459_v39 = vld [vmem:[#allocation5 + $0x6c0] sm:$0xff]  ;;  %733 = vmatpush.msra.mxu2 %v395_v38  ;;  %v240_v38 = vld [vmem:[#allocation2 + $0x24] sm:$0x3f] }
  0x62   :  { %v263_v40 = vld [vmem:[#allocation5 + $0xa0] sm:$0xff]  ;;  %753 = vmatpush.msra.mxu3 %v459_v39  ;;  %v348_v39 = vld [vmem:[#allocation5 + $0x348] sm:$0xff]  ;;  %665 = vst [vmem:[#allocation1 + $0x22] ss:$4 sm:$0xff] %v240_v38 }
  0x63   :  { %v327_v41 = vld [vmem:[#allocation5 + $0x2a0] sm:$0xff]  ;;  %694 = vmatpush.msra.mxu0 %v263_v40  ;;  %v612_v38 = vld [vmem:[#allocation5 + $0xb88] sm:$0xff] }
  0x64   :  { %v391_v42 = vld [vmem:[#allocation5 + $0x4a0] sm:$0xff]  ;;  %714 = vmatpush.msra.mxu1 %v327_v41  ;;  %v242_v41 = vld [vmem:[#allocation2 + $0x32] sm:$0x3f] }
  0x65   :  { %v455_v43 = vld [vmem:[#allocation5 + $0x6a0] sm:$0xff]  ;;  %734 = vmatpush.msra.mxu2 %v391_v42  ;;  %667 = vst [vmem:[#allocation1 + $0x23] ss:$4 sm:$0xff] %v242_v41  ;;  %v416_v41 = vld [vmem:[#allocation5 + $0x568] sm:$0xff] }
  0x66   :  { %v259_v44 = vld [vmem:[#allocation5 + $0x80] sm:$0xff]  ;;  %754 = vmatpush.msra.mxu3 %v455_v43  ;;  %v276_v43 = vld [vmem:[#allocation5 + $0x108] sm:$0xff] }
  0x67   :  { %v323_v45 = vld [vmem:[#allocation5 + $0x280] sm:$0xff]  ;;  %695 = vmatpush.msra.mxu0 %v259_v44  ;;  %v344_v44 = vld [vmem:[#allocation5 + $0x328] sm:$0xff] }
  0x68   :  { %v387_v46 = vld [vmem:[#allocation5 + $0x480] sm:$0xff]  ;;  %715 = vmatpush.msra.mxu1 %v323_v45 }
  0x69   :  { %v451_v47 = vld [vmem:[#allocation5 + $0x680] sm:$0xff]  ;;  %735 = vmatpush.msra.mxu2 %v387_v46 }
  0x6a   :  { %v255_v48 = vld [vmem:[#allocation5 + $0x60] sm:$0xff]  ;;  %755 = vmatpush.msra.mxu3 %v451_v47  ;;  %v272_v47 = vld [vmem:[#allocation5 + $0xe8] sm:$0xff] }
  0x6b   :  { %v319_v49 = vld [vmem:[#allocation5 + $0x260] sm:$0xff]  ;;  %696 = vmatpush.msra.mxu0 %v255_v48  ;;  %v340_v48 = vld [vmem:[#allocation5 + $0x308] sm:$0xff] }
  0x6c   :  { %v383_v50 = vld [vmem:[#allocation5 + $0x460] sm:$0xff]  ;;  %716 = vmatpush.msra.mxu1 %v319_v49 }
  0x6d   :  { %v447_v51 = vld [vmem:[#allocation5 + $0x660] sm:$0xff]  ;;  %736 = vmatpush.msra.mxu2 %v383_v50 }
  0x6e   :  { %v251_v52 = vld [vmem:[#allocation5 + $0x40] sm:$0xff]  ;;  %756 = vmatpush.msra.mxu3 %v447_v51  ;;  %v268_v51 = vld [vmem:[#allocation5 + $0xc8] sm:$0xff] }
  0x6f   :  { %v315_v53 = vld [vmem:[#allocation5 + $0x240] sm:$0xff]  ;;  %697 = vmatpush.msra.mxu0 %v251_v52  ;;  %v336_v52 = vld [vmem:[#allocation5 + $0x2e8] sm:$0xff] }
  0x70   :  { %v239_v56 = vld [vmem:[#allocation2 + $0x1c] sm:$0xff]  ;;  %717 = vmatpush.msra.mxu1 %v315_v53  ;;  %v238_v37 = vld [vmem:[#allocation2 + $0x16] sm:$0x3f] }
  0x71   :  { %v379_v57 = vld [vmem:[#allocation5 + $0x440] sm:$0xff]  ;;  %657 = vst [vmem:[#allocation1 + $0x2] ss:$4 sm:$0xff] %v239_v56  ;;  %v332_v56 = vld [vmem:[#allocation5 + $0x2c8] sm:$0xff] }
  0x72   :  { %v443_v58 = vld [vmem:[#allocation5 + $0x640] sm:$0xff]  ;;  %737 = vmatpush.msra.mxu2 %v379_v57  ;;  %663 = vst [vmem:[#allocation1 + $0x21] ss:$4 sm:$0xff] %v238_v37  ;;  %v420_v37 = vld [vmem:[#allocation5 + $0x588] sm:$0xff] }
  0x73   :  { %v247_v60 = vld [vmem:[#allocation5 + $0x20] sm:$0xff]  ;;  %757 = vmatpush.msra.mxu3 %v443_v58 }
  0x74   :  { %v311_v61 = vld [vmem:[#allocation5 + $0x220] sm:$0xff]  ;;  %698 = vmatpush.msra.mxu0 %v247_v60  ;;  %v328_v60 = vld [vmem:[#allocation5 + $0x2a8] sm:$0xff] }
  0x75   :  { %v375_v62 = vld [vmem:[#allocation5 + $0x420] sm:$0xff]  ;;  %718 = vmatpush.msra.mxu1 %v311_v61 }
  0x76   :  { %v439_v63 = vld [vmem:[#allocation5 + $0x620] sm:$0xff]  ;;  %738 = vmatpush.msra.mxu2 %v375_v62 }
  0x77   :  { %v243_v0 = vld [vmem:[#allocation5] sm:$0xff]  ;;  %758 = vmatpush.msra.mxu3 %v439_v63  ;;  %v256_v63 = vld [vmem:[#allocation5 + $0x68] sm:$0xff] }
  0x78   :  { %v307_v1 = vld [vmem:[#allocation5 + $0x200] sm:$0xff]  ;;  %699 = vmatpush.msra.mxu0 %v243_v0  ;;  %v2310_v13 = vld.sshfl [vmem:[#allocation1 + $0x10] sm:$0xff pattern:$0x73625140]  ;;  %v324_v0 = vld [vmem:[#allocation5 + $0x288] sm:$0xff] }
  0x79   :  { %v371_v2 = vld [vmem:[#allocation5 + $0x400] sm:$0xff]  ;;  %719 = vmatpush.msra.mxu1 %v307_v1  ;;  %v2315_v18 = vld.sshfl [vmem:[#allocation1 + $0x18] sm:$0xff pattern:$0x73625140] }
  0x7a   :  { %v435_v3 = vld [vmem:[#allocation5 + $0x600] sm:$0xff]  ;;  %739 = vmatpush.msra.mxu2 %v371_v2  ;;  %v2318_v23 = vld.sshfl [vmem:[#allocation1 + $0x8] sm:$0xff pattern:$0x73625140] }
  0x7b   :  { %v559_v4 = vld [vmem:[#allocation5 + $0x9e0] sm:$0xff]  ;;  %759 = vmatpush.msra.mxu3 %v435_v3  ;;  %740 = vmatmul.f32.vlgmr.msra.gmra.mxu2 %v2310_v13  ;;  %v252_v3 = vld [vmem:[#allocation5 + $0x48] sm:$0xff] }
  0x7c   :  { %v623_v5 = vld [vmem:[#allocation5 + $0xbe0] sm:$0xff]  ;;  %764 = vmatpush.msrb.mxu0 %v559_v4  ;;  %760 = vmatmul.f32.vlgmr.msra.gmra.mxu3 %v2315_v18  ;;  %v320_v4 = vld [vmem:[#allocation5 + $0x268] sm:$0xff] }
  0x7d   :  { %v631_v6 = vld [vmem:[#allocation5 + $0xc20] sm:$0xff]  ;;  %784 = vmatpush.msrb.mxu1 %v623_v5  ;;  %824 = vmatpush.msrb.mxu3 %v304_v7  ;;  %v248_v7 = vld [vmem:[#allocation5 + $0x28] sm:$0xff] }
  0x7e   :  { %v555_v8 = vld [vmem:[#allocation5 + $0x9c0] sm:$0xff]  ;;  %818 = vmatpush.msrb.mxu2 %v631_v6  ;;  %720 = vmatmul.f32.vlgmr.msra.gmra.mxu1 %v2318_v23 }
  0x7f   :  { %v619_v9 = vld [vmem:[#allocation5 + $0xbc0] sm:$0xff]  ;;  %765 = vmatpush.msrb.mxu0 %v555_v8  ;;  %825 = vmatpush.msrb.mxu3 %v300_v11  ;;  %v2322_v8 = vld.sshfl [vmem:[#allocation1 + $0x30] sm:$0xff pattern:$0x73625140] }
  0x80   :  { %v627_v10 = vld [vmem:[#allocation5 + $0xc00] sm:$0xff]  ;;  %785 = vmatpush.msrb.mxu1 %v619_v9 }
  0x81   :  { %v551_v12 = vld [vmem:[#allocation5 + $0x9a0] sm:$0xff]  ;;  %819 = vmatpush.msrb.mxu2 %v627_v10  ;;  %826 = vmatpush.msrb.mxu3 %v296_v16  ;;  %v316_v10 = vld [vmem:[#allocation5 + $0x248] sm:$0xff] }
  0x82   :  { %v615_v15 = vld [vmem:[#allocation5 + $0xba0] sm:$0xff]  ;;  %766 = vmatpush.msrb.mxu0 %v551_v12  ;;  %v244_v12 = vld [vmem:[#allocation5 + $0x8] sm:$0xff] }
  0x83   :  { %v2312_v17 = vld.sshfl [vmem:[#allocation1] sm:$0xff pattern:$0x73625140]  ;;  %844 = vmatpush.msra.mxu2 %v368_v14  ;;  %786 = vmatpush.msrb.mxu1 %v615_v15  ;;  %v312_v15 = vld [vmem:[#allocation5 + $0x228] sm:$0xff] }
  0x84   :  { %v547_v20 = vld [vmem:[#allocation5 + $0x980] sm:$0xff]  ;;  %700 = vmatmul.f32.vlgmr.msra.gmra.mxu0 %v2312_v17  ;;  %827 = vmatpush.msrb.mxu3 %v292_v22  ;;  %v496_v16 = vld [vmem:[#allocation5 + $0x7e8] sm:$0xff] }
  0x85   :  { %v611_v21 = vld [vmem:[#allocation5 + $0xb80] sm:$0xff]  ;;  %845 = vmatpush.msra.mxu2 %v364_v19  ;;  %767 = vmatpush.msrb.mxu0 %v547_v20  ;;  %v560_v19 = vld [vmem:[#allocation5 + $0x9e8] sm:$0xff] }
  0x86   :  { %v543_v25 = vld [vmem:[#allocation5 + $0x960] sm:$0xff]  ;;  %787 = vmatpush.msrb.mxu1 %v611_v21  ;;  %828 = vmatpush.msrb.mxu3 %v288_v27  ;;  %v2328_v20 = vld.sshfl [vmem:[#allocation1 + $0x28] sm:$0xff pattern:$0x73625140] }
  0x87   :  { %v607_v26 = vld [vmem:[#allocation5 + $0xb60] sm:$0xff]  ;;  %846 = vmatpush.msra.mxu2 %v360_v24  ;;  %768 = vmatpush.msrb.mxu0 %v543_v25  ;;  %v308_v21 = vld [vmem:[#allocation5 + $0x208] sm:$0xff] }
  0x88   :  { %v539_v29 = vld [vmem:[#allocation5 + $0x940] sm:$0xff]  ;;  %788 = vmatpush.msrb.mxu1 %v607_v26  ;;  %829 = vmatpush.msrb.mxu3 %v284_v31  ;;  %v492_v22 = vld [vmem:[#allocation5 + $0x7c8] sm:$0xff] }
  0x89   :  { %v603_v30 = vld [vmem:[#allocation5 + $0xb40] sm:$0xff]  ;;  %847 = vmatpush.msra.mxu2 %v356_v28  ;;  %769 = vmatpush.msrb.mxu0 %v539_v29  ;;  %v556_v24 = vld [vmem:[#allocation5 + $0x9c8] sm:$0xff] }
  0x8a   :  { %v535_v33 = vld [vmem:[#allocation5 + $0x920] sm:$0xff]  ;;  %789 = vmatpush.msrb.mxu1 %v603_v30  ;;  %830 = vmatpush.msrb.mxu3 %v280_v36  ;;  %v432_v25 = vld [vmem:[#allocation5 + $0x5e8] sm:$0xff] }
  0x8b   :  { %v599_v34 = vld [vmem:[#allocation5 + $0xb20] sm:$0xff]  ;;  %848 = vmatpush.msra.mxu2 %v352_v32  ;;  %770 = vmatpush.msrb.mxu0 %v535_v33  ;;  %v624_v26 = vld [vmem:[#allocation5 + $0xbe8] sm:$0xff] }
  0x8c   :  { %v531_v40 = vld [vmem:[#allocation5 + $0x900] sm:$0xff]  ;;  %790 = vmatpush.msrb.mxu1 %v599_v34  ;;  %831 = vmatpush.msrb.mxu3 %v276_v43  ;;  %v488_v27 = vld [vmem:[#allocation5 + $0x7a8] sm:$0xff] }
  0x8d   :  { %v595_v42 = vld [vmem:[#allocation5 + $0xb00] sm:$0xff]  ;;  %849 = vmatpush.msra.mxu2 %v348_v39  ;;  %771 = vmatpush.msrb.mxu0 %v531_v40  ;;  %v552_v28 = vld [vmem:[#allocation5 + $0x9a8] sm:$0xff] }
  0x8e   :  { %v527_v45 = vld [vmem:[#allocation5 + $0x8e0] sm:$0xff]  ;;  %791 = vmatpush.msrb.mxu1 %v595_v42  ;;  %832 = vmatpush.msrb.mxu3 %v272_v47  ;;  %v428_v29 = vld [vmem:[#allocation5 + $0x5c8] sm:$0xff] }
  0x8f   :  { %v591_v46 = vld [vmem:[#allocation5 + $0xae0] sm:$0xff]  ;;  %850 = vmatpush.msra.mxu2 %v344_v44  ;;  %772 = vmatpush.msrb.mxu0 %v527_v45  ;;  %v620_v30 = vld [vmem:[#allocation5 + $0xbc8] sm:$0xff] }
  0x90   :  { %v523_v49 = vld [vmem:[#allocation5 + $0x8c0] sm:$0xff]  ;;  %792 = vmatpush.msrb.mxu1 %v591_v46  ;;  %833 = vmatpush.msrb.mxu3 %v268_v51  ;;  %v484_v31 = vld [vmem:[#allocation5 + $0x788] sm:$0xff] }
  0x91   :  { %v587_v50 = vld [vmem:[#allocation5 + $0xac0] sm:$0xff]  ;;  %851 = vmatpush.msra.mxu2 %v340_v48  ;;  %773 = vmatpush.msrb.mxu0 %v523_v49  ;;  %v548_v32 = vld [vmem:[#allocation5 + $0x988] sm:$0xff] }
  0x92   :  { %v519_v53 = vld [vmem:[#allocation5 + $0x8a0] sm:$0xff]  ;;  %793 = vmatpush.msrb.mxu1 %v587_v50  ;;  %834 = vmatpush.msrb.mxu3 %v264_v55  ;;  %v424_v33 = vld [vmem:[#allocation5 + $0x5a8] sm:$0xff] }
  0x93   :  { %v583_v54 = vld [vmem:[#allocation5 + $0xaa0] sm:$0xff]  ;;  %852 = vmatpush.msra.mxu2 %v336_v52  ;;  %774 = vmatpush.msrb.mxu0 %v519_v53  ;;  %v616_v34 = vld [vmem:[#allocation5 + $0xba8] sm:$0xff] }
  0x94   :  { %v515_v57 = vld [vmem:[#allocation5 + $0x880] sm:$0xff]  ;;  %794 = vmatpush.msrb.mxu1 %v583_v54  ;;  %835 = vmatpush.msrb.mxu3 %v260_v59  ;;  %v544_v36 = vld [vmem:[#allocation5 + $0x968] sm:$0xff] }
  0x95   :  { %v579_v58 = vld [vmem:[#allocation5 + $0xa80] sm:$0xff]  ;;  %853 = vmatpush.msra.mxu2 %v332_v56  ;;  %775 = vmatpush.msrb.mxu0 %v515_v57  ;;  %v476_v39 = vld [vmem:[#allocation5 + $0x748] sm:$0xff] }
  0x96   :  { %v511_v61 = vld [vmem:[#allocation5 + $0x860] sm:$0xff]  ;;  %795 = vmatpush.msrb.mxu1 %v579_v58  ;;  %836 = vmatpush.msrb.mxu3 %v256_v63  ;;  %v540_v40 = vld [vmem:[#allocation5 + $0x948] sm:$0xff] }
  0x97   :  { %v575_v62 = vld [vmem:[#allocation5 + $0xa60] sm:$0xff]  ;;  %854 = vmatpush.msra.mxu2 %v328_v60  ;;  %776 = vmatpush.msrb.mxu0 %v511_v61  ;;  %v608_v42 = vld [vmem:[#allocation5 + $0xb68] sm:$0xff] }
  0x98   :  { %v507_v1 = vld [vmem:[#allocation5 + $0x840] sm:$0xff]  ;;  %796 = vmatpush.msrb.mxu1 %v575_v62  ;;  %837 = vmatpush.msrb.mxu3 %v252_v3  ;;  %v472_v43 = vld [vmem:[#allocation5 + $0x728] sm:$0xff] }
  0x99   :  { %v571_v2 = vld [vmem:[#allocation5 + $0xa40] sm:$0xff]  ;;  %855 = vmatpush.msra.mxu2 %v324_v0  ;;  %777 = vmatpush.msrb.mxu0 %v507_v1  ;;  %v536_v44 = vld [vmem:[#allocation5 + $0x928] sm:$0xff] }
  0x9a   :  { %v503_v5 = vld [vmem:[#allocation5 + $0x820] sm:$0xff]  ;;  %797 = vmatpush.msrb.mxu1 %v571_v2  ;;  %838 = vmatpush.msrb.mxu3 %v248_v7  ;;  %v412_v45 = vld [vmem:[#allocation5 + $0x548] sm:$0xff] }
  0x9b   :  { %v567_v6 = vld [vmem:[#allocation5 + $0xa20] sm:$0xff]  ;;  %856 = vmatpush.msra.mxu2 %v320_v4  ;;  %778 = vmatpush.msrb.mxu0 %v503_v5  ;;  %v604_v46 = vld [vmem:[#allocation5 + $0xb48] sm:$0xff] }
  0x9c   :  { %v499_v9 = vld [vmem:[#allocation5 + $0x800] sm:$0xff]  ;;  %798 = vmatpush.msrb.mxu1 %v567_v6  ;;  %1783 = vmatmul.msk.f32.vlgmr.msrb.gmra.mxu2 %vm681_vm0, %v2322_v8  ;;  %v468_v47 = vld [vmem:[#allocation5 + $0x708] sm:$0xff] }
  0x9d   :  { %v563_v11 = vld [vmem:[#allocation5 + $0xa00] sm:$0xff]  ;;  %779 = vmatpush.msrb.mxu0 %v499_v9  ;;  %857 = vmatpush.msra.mxu2 %v316_v10  ;;  %v532_v48 = vld [vmem:[#allocation5 + $0x908] sm:$0xff] }
  0x9e   :  { %v2324_v14 = vld.sshfl [vmem:[#allocation1 + $0x20] sm:$0xff pattern:$0x73625140]  ;;  %799 = vmatpush.msrb.mxu1 %v563_v11  ;;  %839 = vmatpush.msrb.mxu3 %v244_v12  ;;  %v408_v49 = vld [vmem:[#allocation5 + $0x528] sm:$0xff] }
  0x9f   :  { %780 = vmatmul.f32.vlgmr.msrb.gmra.mxu0 %v2324_v14  ;;  %858 = vmatpush.msra.mxu2 %v312_v15  ;;  %v600_v50 = vld [vmem:[#allocation5 + $0xb28] sm:$0xff] }
  0xa0   :  { %884 = vmatpush.msra.mxu1 %v496_v16  ;;  %904 = vmatpush.msra.mxu3 %v560_v19  ;;  %v464_v51 = vld [vmem:[#allocation5 + $0x6e8] sm:$0xff] }
  0xa1   :  { %800 = vmatmul.f32.vlgmr.msrb.gmra.mxu1 %v2328_v20  ;;  %859 = vmatpush.msra.mxu2 %v308_v21  ;;  %v528_v52 = vld [vmem:[#allocation5 + $0x8e8] sm:$0xff] }
  0xa2   :  { %885 = vmatpush.msra.mxu1 %v492_v22  ;;  %905 = vmatpush.msra.mxu3 %v556_v24  ;;  %v404_v53 = vld [vmem:[#allocation5 + $0x508] sm:$0xff] }
  0xa3   :  { %864 = vmatpush.msra.mxu0 %v432_v25  ;;  %924 = vmatpush.msrb.mxu2 %v624_v26  ;;  %v596_v54 = vld [vmem:[#allocation5 + $0xb08] sm:$0xff]  ;;  %v305_v26 = vld [vmem:[#allocation5 + $0x1f0] sm:$0xff] }
  0xa4   :  { %886 = vmatpush.msra.mxu1 %v488_v27  ;;  %906 = vmatpush.msra.mxu3 %v552_v28  ;;  %v460_v55 = vld [vmem:[#allocation5 + $0x6c8] sm:$0xff]  ;;  %v369_v27 = vld [vmem:[#allocation5 + $0x3f0] sm:$0xff] }
  0xa5   :  { %865 = vmatpush.msra.mxu0 %v428_v29  ;;  %925 = vmatpush.msrb.mxu2 %v620_v30  ;;  %v524_v56 = vld [vmem:[#allocation5 + $0x8c8] sm:$0xff]  ;;  %v301_v30 = vld [vmem:[#allocation5 + $0x1d0] sm:$0xff] }
  0xa6   :  { %887 = vmatpush.msra.mxu1 %v484_v31  ;;  %907 = vmatpush.msra.mxu3 %v548_v32  ;;  %v400_v57 = vld [vmem:[#allocation5 + $0x4e8] sm:$0xff]  ;;  %v365_v31 = vld [vmem:[#allocation5 + $0x3d0] sm:$0xff] }
  0xa7   :  { %866 = vmatpush.msra.mxu0 %v424_v33  ;;  %926 = vmatpush.msrb.mxu2 %v616_v34  ;;  %v592_v58 = vld [vmem:[#allocation5 + $0xae8] sm:$0xff]  ;;  %v497_v32 = vld [vmem:[#allocation5 + $0x7f0] sm:$0xff] }
  0xa8   :  { %888 = vmatpush.msra.mxu1 %v480_v35  ;;  %908 = vmatpush.msra.mxu3 %v544_v36  ;;  %v456_v59 = vld [vmem:[#allocation5 + $0x6a8] sm:$0xff]  ;;  %v297_v33 = vld [vmem:[#allocation5 + $0x1b0] sm:$0xff] }
  0xa9   :  { %867 = vmatpush.msra.mxu0 %v420_v37  ;;  %927 = vmatpush.msrb.mxu2 %v612_v38  ;;  %v520_v60 = vld [vmem:[#allocation5 + $0x8a8] sm:$0xff]  ;;  %v361_v34 = vld [vmem:[#allocation5 + $0x3b0] sm:$0xff] }
  0xaa   :  { %889 = vmatpush.msra.mxu1 %v476_v39  ;;  %909 = vmatpush.msra.mxu3 %v540_v40  ;;  %v396_v61 = vld [vmem:[#allocation5 + $0x4c8] sm:$0xff]  ;;  %v493_v36 = vld [vmem:[#allocation5 + $0x7d0] sm:$0xff] }
  0xab   :  { %868 = vmatpush.msra.mxu0 %v416_v41  ;;  %928 = vmatpush.msrb.mxu2 %v608_v42  ;;  %v588_v62 = vld [vmem:[#allocation5 + $0xac8] sm:$0xff]  ;;  %v293_v37 = vld [vmem:[#allocation5 + $0x190] sm:$0xff] }
  0xac   :  { %890 = vmatpush.msra.mxu1 %v472_v43  ;;  %910 = vmatpush.msra.mxu3 %v536_v44  ;;  %v452_v63 = vld [vmem:[#allocation5 + $0x688] sm:$0xff]  ;;  %v357_v38 = vld [vmem:[#allocation5 + $0x390] sm:$0xff] }
  0xad   :  { %869 = vmatpush.msra.mxu0 %v412_v45  ;;  %929 = vmatpush.msrb.mxu2 %v604_v46  ;;  %v516_v0 = vld [vmem:[#allocation5 + $0x888] sm:$0xff]  ;;  %v489_v40 = vld [vmem:[#allocation5 + $0x7b0] sm:$0xff] }
  0xae   :  { %891 = vmatpush.msra.mxu1 %v468_v47  ;;  %911 = vmatpush.msra.mxu3 %v532_v48  ;;  %v392_v1 = vld [vmem:[#allocation5 + $0x4a8] sm:$0xff]  ;;  %v289_v41 = vld [vmem:[#allocation5 + $0x170] sm:$0xff] }
  0xaf   :  { %870 = vmatpush.msra.mxu0 %v408_v49  ;;  %930 = vmatpush.msrb.mxu2 %v600_v50  ;;  %v584_v2 = vld [vmem:[#allocation5 + $0xaa8] sm:$0xff]  ;;  %v353_v42 = vld [vmem:[#allocation5 + $0x370] sm:$0xff] }
  0xb0   :  { %892 = vmatpush.msra.mxu1 %v464_v51  ;;  %912 = vmatpush.msra.mxu3 %v528_v52  ;;  %v448_v3 = vld [vmem:[#allocation5 + $0x668] sm:$0xff]  ;;  %v433_v43 = vld [vmem:[#allocation5 + $0x5f0] sm:$0xff] }
  0xb1   :  { %871 = vmatpush.msra.mxu0 %v404_v53  ;;  %931 = vmatpush.msrb.mxu2 %v596_v54  ;;  %v512_v4 = vld [vmem:[#allocation5 + $0x868] sm:$0xff]  ;;  %v485_v44 = vld [vmem:[#allocation5 + $0x790] sm:$0xff] }
  0xb2   :  { %893 = vmatpush.msra.mxu1 %v460_v55  ;;  %913 = vmatpush.msra.mxu3 %v524_v56  ;;  %v388_v5 = vld [vmem:[#allocation5 + $0x488] sm:$0xff]  ;;  %v285_v45 = vld [vmem:[#allocation5 + $0x150] sm:$0xff] }
  0xb3   :  { %872 = vmatpush.msra.mxu0 %v400_v57  ;;  %932 = vmatpush.msrb.mxu2 %v592_v58  ;;  %v580_v6 = vld [vmem:[#allocation5 + $0xa88] sm:$0xff]  ;;  %v349_v46 = vld [vmem:[#allocation5 + $0x350] sm:$0xff] }
  0xb4   :  { %894 = vmatpush.msra.mxu1 %v456_v59  ;;  %914 = vmatpush.msra.mxu3 %v520_v60  ;;  %v444_v7 = vld [vmem:[#allocation5 + $0x648] sm:$0xff]  ;;  %v429_v47 = vld [vmem:[#allocation5 + $0x5d0] sm:$0xff] }
  0xb5   :  { %873 = vmatpush.msra.mxu0 %v396_v61  ;;  %933 = vmatpush.msrb.mxu2 %v588_v62  ;;  %v508_v9 = vld [vmem:[#allocation5 + $0x848] sm:$0xff]  ;;  %v481_v48 = vld [vmem:[#allocation5 + $0x770] sm:$0xff] }
  0xb6   :  { %895 = vmatpush.msra.mxu1 %v452_v63  ;;  %915 = vmatpush.msra.mxu3 %v516_v0  ;;  %v384_v10 = vld [vmem:[#allocation5 + $0x468] sm:$0xff]  ;;  %v281_v49 = vld [vmem:[#allocation5 + $0x130] sm:$0xff] }
  0xb7   :  { %874 = vmatpush.msra.mxu0 %v392_v1  ;;  %934 = vmatpush.msrb.mxu2 %v584_v2  ;;  %v576_v11 = vld [vmem:[#allocation5 + $0xa68] sm:$0xff]  ;;  %v345_v50 = vld [vmem:[#allocation5 + $0x330] sm:$0xff] }
  0xb8   :  { %840 = vmatmul.f32.vlgmr.msrb.gmra.mxu3 %v2312_v17  ;;  %896 = vmatpush.msra.mxu1 %v448_v3  ;;  %v440_v12 = vld [vmem:[#allocation5 + $0x628] sm:$0xff]  ;;  %v425_v51 = vld [vmem:[#allocation5 + $0x5b0] sm:$0xff] }
  0xb9   :  { %916 = vmatpush.msra.mxu3 %v512_v4  ;;  %875 = vmatpush.msra.mxu0 %v388_v5  ;;  %v504_v15 = vld [vmem:[#allocation5 + $0x828] sm:$0xff]  ;;  %v477_v52 = vld [vmem:[#allocation5 + $0x750] sm:$0xff] }
  0xba   :  { %935 = vmatpush.msrb.mxu2 %v580_v6  ;;  %897 = vmatpush.msra.mxu1 %v444_v7  ;;  %v380_v16 = vld [vmem:[#allocation5 + $0x448] sm:$0xff]  ;;  %v277_v53 = vld [vmem:[#allocation5 + $0x110] sm:$0xff] }
  0xbb   :  { %860 = vmatmul.f32.vlgmr.msra.gmra.mxu2 %v2318_v23  ;;  %917 = vmatpush.msra.mxu3 %v508_v9  ;;  %v572_v19 = vld [vmem:[#allocation5 + $0xa48] sm:$0xff]  ;;  %v341_v54 = vld [vmem:[#allocation5 + $0x310] sm:$0xff] }
  0xbc   :  { %876 = vmatpush.msra.mxu0 %v384_v10  ;;  %v436_v21 = vld [vmem:[#allocation5 + $0x608] sm:$0xff]  ;;  %936 = vmatpush.msrb.mxu2 %v576_v11  ;;  %v421_v55 = vld [vmem:[#allocation5 + $0x590] sm:$0xff] }
  0xbd   :  { %898 = vmatpush.msra.mxu1 %v440_v12  ;;  %v500_v22 = vld [vmem:[#allocation5 + $0x808] sm:$0xff]  ;;  %918 = vmatpush.msra.mxu3 %v504_v15  ;;  %v473_v56 = vld [vmem:[#allocation5 + $0x730] sm:$0xff] }
  0xbe   :  { %v376_v24 = vld [vmem:[#allocation5 + $0x428] sm:$0xff]  ;;  %877 = vmatpush.msra.mxu0 %v380_v16  ;;  %937 = vmatpush.msrb.mxu2 %v572_v19  ;;  %v273_v57 = vld [vmem:[#allocation5 + $0xf0] sm:$0xff] }
  0xbf   :  { %v568_v25 = vld [vmem:[#allocation5 + $0xa28] sm:$0xff]  ;;  %899 = vmatpush.msra.mxu1 %v436_v21  ;;  %919 = vmatpush.msra.mxu3 %v500_v22  ;;  %v337_v58 = vld [vmem:[#allocation5 + $0x2f0] sm:$0xff] }
  0xc0   :  { %v372_v28 = vld [vmem:[#allocation5 + $0x408] sm:$0xff]  ;;  %878 = vmatpush.msra.mxu0 %v376_v24  ;;  %938 = vmatpush.msrb.mxu2 %v568_v25  ;;  %v417_v59 = vld [vmem:[#allocation5 + $0x570] sm:$0xff] }
  0xc1   :  { %v564_v29 = vld [vmem:[#allocation5 + $0xa08] sm:$0xff]  ;;  %964 = vmatpush.msrb.mxu1 %v305_v26  ;;  %984 = vmatpush.msrb.mxu3 %v369_v27  ;;  %v469_v60 = vld [vmem:[#allocation5 + $0x710] sm:$0xff] }
  0xc2   :  { %879 = vmatpush.msra.mxu0 %v372_v28  ;;  %920 = vmatmul.f32.vlgmr.msra.gmra.mxu3 %v2324_v14  ;;  %v632_v35 = vld [vmem:[#allocation5 + $0xc28] sm:$0xff]  ;;  %v269_v61 = vld [vmem:[#allocation5 + $0xd0] sm:$0xff] }
  0xc3   :  { %939 = vmatpush.msrb.mxu2 %v564_v29  ;;  %965 = vmatpush.msrb.mxu1 %v301_v30  ;;  %v628_v39 = vld [vmem:[#allocation5 + $0xc08] sm:$0xff]  ;;  %v333_v62 = vld [vmem:[#allocation5 + $0x2d0] sm:$0xff] }
  0xc4   :  { %985 = vmatpush.msrb.mxu3 %v365_v31  ;;  %880 = vmatmul.f32.vlgmr.msra.gmra.mxu0 %v2310_v13  ;;  %v413_v63 = vld [vmem:[#allocation5 + $0x550] sm:$0xff] }
  0xc5   :  { %940 = vmatmul.f32.vlgmr.msrb.gmra.mxu2 %v2328_v20  ;;  %966 = vmatpush.msrb.mxu1 %v297_v33  ;;  %v465_v0 = vld [vmem:[#allocation5 + $0x6f0] sm:$0xff] }
  0xc6   :  { %1024 = vmatpush.msra.mxu2 %v497_v32  ;;  %986 = vmatpush.msrb.mxu3 %v361_v34  ;;  %v265_v1 = vld [vmem:[#allocation5 + $0xb0] sm:$0xff] }
  0xc7   :  { %900 = vmatmul.f32.vlgmr.msra.gmra.mxu1 %v2315_v18  ;;  %958 = vmatpush.msrb.mxu0 %v632_v35  ;;  %v329_v2 = vld [vmem:[#allocation5 + $0x2b0] sm:$0xff] }
  0xc8   :  { %1025 = vmatpush.msra.mxu2 %v493_v36  ;;  %967 = vmatpush.msrb.mxu1 %v293_v37  ;;  %v409_v3 = vld [vmem:[#allocation5 + $0x530] sm:$0xff] }
  0xc9   :  { %987 = vmatpush.msrb.mxu3 %v357_v38  ;;  %959 = vmatpush.msrb.mxu0 %v628_v39  ;;  %v461_v4 = vld [vmem:[#allocation5 + $0x6d0] sm:$0xff]  ;;  %v306_v39 = vld [vmem:[#allocation5 + $0x1f8] sm:$0xff] }
  0xca   :  { %1026 = vmatpush.msra.mxu2 %v489_v40  ;;  %968 = vmatpush.msrb.mxu1 %v289_v41  ;;  %v261_v5 = vld [vmem:[#allocation5 + $0x90] sm:$0xff] }
  0xcb   :  { %988 = vmatpush.msrb.mxu3 %v353_v42  ;;  %1004 = vmatpush.msra.mxu0 %v433_v43  ;;  %v325_v6 = vld [vmem:[#allocation5 + $0x290] sm:$0xff]  ;;  %v302_v43 = vld [vmem:[#allocation5 + $0x1d8] sm:$0xff] }
  0xcc   :  { %1027 = vmatpush.msra.mxu2 %v485_v44  ;;  %969 = vmatpush.msrb.mxu1 %v285_v45  ;;  %v405_v7 = vld [vmem:[#allocation5 + $0x510] sm:$0xff] }
  0xcd   :  { %989 = vmatpush.msrb.mxu3 %v349_v46  ;;  %1005 = vmatpush.msra.mxu0 %v429_v47  ;;  %v457_v9 = vld [vmem:[#allocation5 + $0x6b0] sm:$0xff] }
  0xce   :  { %1028 = vmatpush.msra.mxu2 %v481_v48  ;;  %1784 = vmatmul.msk.f32.vlgmr.msrb.gmra.mxu0 %vm681_vm0, %v2322_v8  ;;  %v257_v10 = vld [vmem:[#allocation5 + $0x70] sm:$0xff]  ;;  %v298_v48 = vld [vmem:[#allocation5 + $0x1b8] sm:$0xff] }
  0xcf   :  { %970 = vmatpush.msrb.mxu1 %v281_v49  ;;  %990 = vmatpush.msrb.mxu3 %v345_v50  ;;  %v321_v11 = vld [vmem:[#allocation5 + $0x270] sm:$0xff] }
  0xd0   :  { %1006 = vmatpush.msra.mxu0 %v425_v51  ;;  %1029 = vmatpush.msra.mxu2 %v477_v52  ;;  %v401_v12 = vld [vmem:[#allocation5 + $0x4f0] sm:$0xff] }
  0xd1   :  { %971 = vmatpush.msrb.mxu1 %v277_v53  ;;  %991 = vmatpush.msrb.mxu3 %v341_v54  ;;  %v453_v15 = vld [vmem:[#allocation5 + $0x690] sm:$0xff] }
  0xd2   :  { %1007 = vmatpush.msra.mxu0 %v421_v55  ;;  %1030 = vmatpush.msra.mxu2 %v473_v56  ;;  %v253_v16 = vld [vmem:[#allocation5 + $0x50] sm:$0xff]  ;;  %v290_v55 = vld [vmem:[#allocation5 + $0x178] sm:$0xff] }
  0xd3   :  { %972 = vmatpush.msrb.mxu1 %v273_v57  ;;  %992 = vmatpush.msrb.mxu3 %v337_v58  ;;  %v317_v19 = vld [vmem:[#allocation5 + $0x250] sm:$0xff]  ;;  %v370_v56 = vld [vmem:[#allocation5 + $0x3f8] sm:$0xff] }
  0xd4   :  { %1008 = vmatpush.msra.mxu0 %v417_v59  ;;  %1031 = vmatpush.msra.mxu2 %v469_v60  ;;  %v397_v21 = vld [vmem:[#allocation5 + $0x4d0] sm:$0xff]  ;;  %v282_v60 = vld [vmem:[#allocation5 + $0x138] sm:$0xff] }
  0xd5   :  { %973 = vmatpush.msrb.mxu1 %v269_v61  ;;  %993 = vmatpush.msrb.mxu3 %v333_v62  ;;  %v449_v22 = vld [vmem:[#allocation5 + $0x670] sm:$0xff]  ;;  %v362_v62 = vld [vmem:[#allocation5 + $0x3b8] sm:$0xff] }
  0xd6   :  { %1009 = vmatpush.msra.mxu0 %v413_v63  ;;  %1032 = vmatpush.msra.mxu2 %v465_v0  ;;  %v249_v24 = vld [vmem:[#allocation5 + $0x30] sm:$0xff]  ;;  %v278_v0 = vld [vmem:[#allocation5 + $0x118] sm:$0xff] }
  0xd7   :  { %974 = vmatpush.msrb.mxu1 %v265_v1  ;;  %994 = vmatpush.msrb.mxu3 %v329_v2  ;;  %v313_v25 = vld [vmem:[#allocation5 + $0x230] sm:$0xff]  ;;  %v358_v2 = vld [vmem:[#allocation5 + $0x398] sm:$0xff] }
  0xd8   :  { %1010 = vmatpush.msra.mxu0 %v409_v3  ;;  %1033 = vmatpush.msra.mxu2 %v461_v4  ;;  %v393_v26 = vld [vmem:[#allocation5 + $0x4b0] sm:$0xff] }
  0xd9   :  { %975 = vmatpush.msrb.mxu1 %v261_v5  ;;  %995 = vmatpush.msrb.mxu3 %v325_v6  ;;  %v445_v27 = vld [vmem:[#allocation5 + $0x650] sm:$0xff]  ;;  %v354_v5 = vld [vmem:[#allocation5 + $0x378] sm:$0xff] }
  0xda   :  { %1011 = vmatpush.msra.mxu0 %v405_v7  ;;  %1034 = vmatpush.msra.mxu2 %v457_v9  ;;  %v245_v28 = vld [vmem:[#allocation5 + $0x10] sm:$0xff]  ;;  %v270_v7 = vld [vmem:[#allocation5 + $0xd8] sm:$0xff] }
  0xdb   :  { %976 = vmatpush.msrb.mxu1 %v257_v10  ;;  %996 = vmatpush.msrb.mxu3 %v321_v11  ;;  %v309_v29 = vld [vmem:[#allocation5 + $0x210] sm:$0xff]  ;;  %v350_v10 = vld [vmem:[#allocation5 + $0x358] sm:$0xff] }
  0xdc   :  { %1012 = vmatpush.msra.mxu0 %v401_v12  ;;  %1035 = vmatpush.msra.mxu2 %v453_v15  ;;  %v389_v30 = vld [vmem:[#allocation5 + $0x490] sm:$0xff]  ;;  %v266_v12 = vld [vmem:[#allocation5 + $0xb8] sm:$0xff] }
  0xdd   :  { %977 = vmatpush.msrb.mxu1 %v253_v16  ;;  %997 = vmatpush.msrb.mxu3 %v317_v19  ;;  %v441_v31 = vld [vmem:[#allocation5 + $0x630] sm:$0xff]  ;;  %v346_v16 = vld [vmem:[#allocation5 + $0x338] sm:$0xff] }
  0xde   :  { %1013 = vmatpush.msra.mxu0 %v397_v21  ;;  %1036 = vmatpush.msra.mxu2 %v449_v22  ;;  %v561_v32 = vld [vmem:[#allocation5 + $0x9f0] sm:$0xff]  ;;  %v262_v21 = vld [vmem:[#allocation5 + $0x98] sm:$0xff] }
  0xdf   :  { %978 = vmatpush.msrb.mxu1 %v249_v24  ;;  %998 = vmatpush.msrb.mxu3 %v313_v25  ;;  %v625_v33 = vld [vmem:[#allocation5 + $0xbf0] sm:$0xff]  ;;  %v342_v24 = vld [vmem:[#allocation5 + $0x318] sm:$0xff] }
  0xe0   :  { %1014 = vmatpush.msra.mxu0 %v393_v26  ;;  %1037 = vmatpush.msra.mxu2 %v445_v27  ;;  %v385_v34 = vld [vmem:[#allocation5 + $0x470] sm:$0xff]  ;;  %v258_v26 = vld [vmem:[#allocation5 + $0x78] sm:$0xff] }
  0xe1   :  { %979 = vmatpush.msrb.mxu1 %v245_v28  ;;  %999 = vmatpush.msrb.mxu3 %v309_v29  ;;  %v437_v35 = vld [vmem:[#allocation5 + $0x610] sm:$0xff]  ;;  %v338_v28 = vld [vmem:[#allocation5 + $0x2f8] sm:$0xff] }
  0xe2   :  { %1015 = vmatpush.msra.mxu0 %v389_v30  ;;  %v557_v36 = vld [vmem:[#allocation5 + $0x9d0] sm:$0xff]  ;;  %1038 = vmatpush.msra.mxu2 %v441_v31  ;;  %v254_v30 = vld [vmem:[#allocation5 + $0x58] sm:$0xff] }
  0xe3   :  { %1044 = vmatpush.msra.mxu1 %v561_v32  ;;  %v621_v37 = vld [vmem:[#allocation5 + $0xbd0] sm:$0xff]  ;;  %1064 = vmatpush.msra.mxu3 %v625_v33  ;;  %v334_v32 = vld [vmem:[#allocation5 + $0x2d8] sm:$0xff] }
  0xe4   :  { %v381_v38 = vld [vmem:[#allocation5 + $0x450] sm:$0xff]  ;;  %1016 = vmatpush.msra.mxu0 %v385_v34  ;;  %1039 = vmatpush.msra.mxu2 %v437_v35  ;;  %v250_v34 = vld [vmem:[#allocation5 + $0x38] sm:$0xff] }
  0xe5   :  { %1045 = vmatpush.msra.mxu1 %v557_v36  ;;  %v553_v40 = vld [vmem:[#allocation5 + $0x9b0] sm:$0xff]  ;;  %1065 = vmatpush.msra.mxu3 %v621_v37  ;;  %v330_v35 = vld [vmem:[#allocation5 + $0x2b8] sm:$0xff] }
  0xe6   :  { %v617_v41 = vld [vmem:[#allocation5 + $0xbb0] sm:$0xff]  ;;  %1017 = vmatpush.msra.mxu0 %v381_v38  ;;  %1000 = vmatmul.f32.vlgmr.msrb.gmra.mxu3 %v2318_v23  ;;  %v294_v23 = vld [vmem:[#allocation5 + $0x198] sm:$0xff] }
  0xe7   :  { %v377_v42 = vld [vmem:[#allocation5 + $0x430] sm:$0xff]  ;;  %1104 = vmatpush.msrb.mxu2 %v306_v39  ;;  %1046 = vmatpush.msra.mxu1 %v553_v40  ;;  %v434_v36 = vld [vmem:[#allocation5 + $0x5f8] sm:$0xff] }
  0xe8   :  { %v549_v44 = vld [vmem:[#allocation5 + $0x990] sm:$0xff]  ;;  %1066 = vmatpush.msra.mxu3 %v617_v41  ;;  %1018 = vmatpush.msra.mxu0 %v377_v42  ;;  %v498_v37 = vld [vmem:[#allocation5 + $0x7f8] sm:$0xff] }
  0xe9   :  { %v613_v45 = vld [vmem:[#allocation5 + $0xb90] sm:$0xff]  ;;  %1105 = vmatpush.msrb.mxu2 %v302_v43  ;;  %1047 = vmatpush.msra.mxu1 %v549_v44  ;;  %v246_v38 = vld [vmem:[#allocation5 + $0x18] sm:$0xff] }
  0xea   :  { %v373_v46 = vld [vmem:[#allocation5 + $0x410] sm:$0xff]  ;;  %1067 = vmatpush.msra.mxu3 %v613_v45  ;;  %980 = vmatmul.f32.vlgmr.msrb.gmra.mxu1 %v2312_v17  ;;  %v286_v17 = vld [vmem:[#allocation5 + $0x158] sm:$0xff] }
  0xeb   :  { %v545_v47 = vld [vmem:[#allocation5 + $0x970] sm:$0xff]  ;;  %1019 = vmatpush.msra.mxu0 %v373_v46  ;;  %1040 = vmatmul.f32.vlgmr.msra.gmra.mxu2 %v2315_v18  ;;  %v366_v18 = vld [vmem:[#allocation5 + $0x3d8] sm:$0xff] }
  0xec   :  { %v609_v49 = vld [vmem:[#allocation5 + $0xb70] sm:$0xff]  ;;  %1048 = vmatpush.msra.mxu1 %v545_v47  ;;  %1106 = vmatpush.msrb.mxu2 %v298_v48  ;;  %v326_v39 = vld [vmem:[#allocation5 + $0x298] sm:$0xff] }
  0xed   :  { %v633_v50 = vld [vmem:[#allocation5 + $0xc30] sm:$0xff]  ;;  %1068 = vmatpush.msra.mxu3 %v609_v49  ;;  %1020 = vmatmul.f32.vlgmr.msra.gmra.mxu0 %v2310_v13  ;;  %v274_v13 = vld [vmem:[#allocation5 + $0xf8] sm:$0xff] }
  0xee   :  { %v541_v51 = vld [vmem:[#allocation5 + $0x950] sm:$0xff]  ;;  %1098 = vmatpush.msrb.mxu0 %v633_v50  ;;  %1107 = vmatpush.msrb.mxu2 %v294_v23  ;;  %v430_v40 = vld [vmem:[#allocation5 + $0x5d8] sm:$0xff] }
  0xef   :  { %v605_v52 = vld [vmem:[#allocation5 + $0xb50] sm:$0xff]  ;;  %1049 = vmatpush.msra.mxu1 %v541_v51  ;;  %v494_v41 = vld [vmem:[#allocation5 + $0x7d8] sm:$0xff] }
  0xf0   :  { %v629_v53 = vld [vmem:[#allocation5 + $0xc10] sm:$0xff]  ;;  %1069 = vmatpush.msra.mxu3 %v605_v52  ;;  %1108 = vmatpush.msrb.mxu2 %v290_v55  ;;  %v562_v42 = vld [vmem:[#allocation5 + $0x9f8] sm:$0xff] }
  0xf1   :  { %v537_v54 = vld [vmem:[#allocation5 + $0x930] sm:$0xff]  ;;  %1099 = vmatpush.msrb.mxu0 %v629_v53  ;;  %v322_v43 = vld [vmem:[#allocation5 + $0x278] sm:$0xff] }
  0xf2   :  { %v601_v57 = vld [vmem:[#allocation5 + $0xb30] sm:$0xff]  ;;  %1050 = vmatpush.msra.mxu1 %v537_v54  ;;  %1109 = vmatpush.msrb.mxu2 %v286_v17  ;;  %v426_v44 = vld [vmem:[#allocation5 + $0x5b8] sm:$0xff] }
  0xf3   :  { %v533_v58 = vld [vmem:[#allocation5 + $0x910] sm:$0xff]  ;;  %1124 = vmatpush.msra.mxu0 %v370_v56  ;;  %1070 = vmatpush.msra.mxu3 %v601_v57  ;;  %v490_v45 = vld [vmem:[#allocation5 + $0x7b8] sm:$0xff] }
  0xf4   :  { %v597_v59 = vld [vmem:[#allocation5 + $0xb10] sm:$0xff]  ;;  %1051 = vmatpush.msra.mxu1 %v533_v58  ;;  %1110 = vmatpush.msrb.mxu2 %v282_v60  ;;  %v558_v46 = vld [vmem:[#allocation5 + $0x9d8] sm:$0xff] }
  0xf5   :  { %v529_v61 = vld [vmem:[#allocation5 + $0x8f0] sm:$0xff]  ;;  %1125 = vmatpush.msra.mxu0 %v366_v18  ;;  %1071 = vmatpush.msra.mxu3 %v597_v59  ;;  %v486_v47 = vld [vmem:[#allocation5 + $0x798] sm:$0xff] }
  0xf6   :  { %v593_v63 = vld [vmem:[#allocation5 + $0xaf0] sm:$0xff]  ;;  %1052 = vmatpush.msra.mxu1 %v529_v61  ;;  %1111 = vmatpush.msrb.mxu2 %v278_v0  ;;  %v554_v48 = vld [vmem:[#allocation5 + $0x9b8] sm:$0xff] }
  0xf7   :  { %v525_v1 = vld [vmem:[#allocation5 + $0x8d0] sm:$0xff]  ;;  %1126 = vmatpush.msra.mxu0 %v362_v62  ;;  %1072 = vmatpush.msra.mxu3 %v593_v63  ;;  %v314_v49 = vld [vmem:[#allocation5 + $0x238] sm:$0xff] }
  0xf8   :  { %v589_v3 = vld [vmem:[#allocation5 + $0xad0] sm:$0xff]  ;;  %1053 = vmatpush.msra.mxu1 %v525_v1  ;;  %1112 = vmatpush.msrb.mxu2 %v274_v13  ;;  %v418_v50 = vld [vmem:[#allocation5 + $0x578] sm:$0xff] }
  0xf9   :  { %v521_v4 = vld [vmem:[#allocation5 + $0x8b0] sm:$0xff]  ;;  %1127 = vmatpush.msra.mxu0 %v358_v2  ;;  %1073 = vmatpush.msra.mxu3 %v589_v3  ;;  %v482_v51 = vld [vmem:[#allocation5 + $0x778] sm:$0xff] }
  0xfa   :  { %v585_v6 = vld [vmem:[#allocation5 + $0xab0] sm:$0xff]  ;;  %1054 = vmatpush.msra.mxu1 %v521_v4  ;;  %1113 = vmatpush.msrb.mxu2 %v270_v7  ;;  %v550_v23 = vld [vmem:[#allocation5 + $0x998] sm:$0xff] }
  0xfb   :  { %v517_v9 = vld [vmem:[#allocation5 + $0x890] sm:$0xff]  ;;  %1128 = vmatpush.msra.mxu0 %v354_v5  ;;  %1074 = vmatpush.msra.mxu3 %v585_v6  ;;  %v310_v52 = vld [vmem:[#allocation5 + $0x218] sm:$0xff] }
  0xfc   :  { %v581_v11 = vld [vmem:[#allocation5 + $0xa90] sm:$0xff]  ;;  %1055 = vmatpush.msra.mxu1 %v517_v9  ;;  %1114 = vmatpush.msrb.mxu2 %v266_v12  ;;  %v414_v53 = vld [vmem:[#allocation5 + $0x558] sm:$0xff] }
  0xfd   :  { %v513_v15 = vld [vmem:[#allocation5 + $0x870] sm:$0xff]  ;;  %1129 = vmatpush.msra.mxu0 %v350_v10  ;;  %1075 = vmatpush.msra.mxu3 %v581_v11  ;;  %v478_v54 = vld [vmem:[#allocation5 + $0x758] sm:$0xff] }
  0xfe   :  { %v577_v19 = vld [vmem:[#allocation5 + $0xa70] sm:$0xff]  ;;  %1056 = vmatpush.msra.mxu1 %v513_v15  ;;  %1115 = vmatpush.msrb.mxu2 %v262_v21  ;;  %v546_v55 = vld [vmem:[#allocation5 + $0x978] sm:$0xff] }
  0xff   :  { %v509_v22 = vld [vmem:[#allocation5 + $0x850] sm:$0xff]  ;;  %1130 = vmatpush.msra.mxu0 %v346_v16  ;;  %1076 = vmatpush.msra.mxu3 %v577_v19  ;;  %v626_v56 = vld [vmem:[#allocation5 + $0xbf8] sm:$0xff] }
 0x100   :  { %v573_v25 = vld [vmem:[#allocation5 + $0xa50] sm:$0xff]  ;;  %1057 = vmatpush.msra.mxu1 %v509_v22  ;;  %1116 = vmatpush.msrb.mxu2 %v258_v26  ;;  %v410_v57 = vld [vmem:[#allocation5 + $0x538] sm:$0xff] }
 0x101   :  { %v505_v27 = vld [vmem:[#allocation5 + $0x830] sm:$0xff]  ;;  %1131 = vmatpush.msra.mxu0 %v342_v24  ;;  %1077 = vmatpush.msra.mxu3 %v573_v25  ;;  %v474_v17 = vld [vmem:[#allocation5 + $0x738] sm:$0xff] }
 0x102   :  { %v569_v29 = vld [vmem:[#allocation5 + $0xa30] sm:$0xff]  ;;  %1058 = vmatpush.msra.mxu1 %v505_v27  ;;  %1117 = vmatpush.msrb.mxu2 %v254_v30  ;;  %v542_v58 = vld [vmem:[#allocation5 + $0x958] sm:$0xff] }
 0x103   :  { %v501_v31 = vld [vmem:[#allocation5 + $0x810] sm:$0xff]  ;;  %1132 = vmatpush.msra.mxu0 %v338_v28  ;;  %1078 = vmatpush.msra.mxu3 %v569_v29  ;;  %v622_v18 = vld [vmem:[#allocation5 + $0xbd8] sm:$0xff]  ;;  %v1818_v28 = vld.sshfl [vmem:[#allocation1] sm:$0xff pattern:$0x73625140] }
 0x104   :  { %v565_v33 = vld [vmem:[#allocation5 + $0xa10] sm:$0xff]  ;;  %1059 = vmatpush.msra.mxu1 %v501_v31  ;;  %1118 = vmatpush.msrb.mxu2 %v250_v34  ;;  %v406_v59 = vld [vmem:[#allocation5 + $0x518] sm:$0xff] }
 0x105   :  { %1133 = vmatpush.msra.mxu0 %v334_v32  ;;  %1079 = vmatpush.msra.mxu3 %v565_v33  ;;  %v538_v60 = vld [vmem:[#allocation5 + $0x938] sm:$0xff] }
 0x106   :  { %1060 = vmatmul.f32.vlgmr.msra.gmra.mxu1 %v2324_v14  ;;  %1080 = vmatmul.f32.vlgmr.msra.gmra.mxu3 %v2328_v20  ;;  %v318_v14 = vld [vmem:[#allocation5 + $0x258] sm:$0xff] }
 0x107   :  { %1134 = vmatpush.msra.mxu0 %v330_v35  ;;  %1144 = vmatpush.msrb.mxu1 %v434_v36  ;;  %v422_v20 = vld [vmem:[#allocation5 + $0x598] sm:$0xff] }
 0x108   :  { %1164 = vmatpush.msrb.mxu3 %v498_v37  ;;  %1119 = vmatpush.msrb.mxu2 %v246_v38  ;;  %v618_v61 = vld [vmem:[#allocation5 + $0xbb8] sm:$0xff] }
 0x109   :  { %1135 = vmatpush.msra.mxu0 %v326_v39  ;;  %1145 = vmatpush.msrb.mxu1 %v430_v40  ;;  %v402_v62 = vld [vmem:[#allocation5 + $0x4f8] sm:$0xff]  ;;  %v2348_v39 = vld [vmem:[#allocation7] sm:$0xf] }
 0x10a   :  { %1165 = vmatpush.msrb.mxu3 %v494_v41  ;;  %1184 = vmatpush.msra.mxu2 %v562_v42  ;;  %v466_v63 = vld [vmem:[#allocation5 + $0x6f8] sm:$0xff] }
 0x10b   :  { %1136 = vmatpush.msra.mxu0 %v322_v43  ;;  %1146 = vmatpush.msrb.mxu1 %v426_v44  ;;  %v534_v0 = vld [vmem:[#allocation5 + $0x918] sm:$0xff]  ;;  %v1276_v43 = vld [vmem:[#allocation8 + $0xe0] sm:$0xff]  ;;  %v637_v44 = vperm.slane %v2348_v39, 0 }
 0x10c   :  { %1166 = vmatpush.msrb.mxu3 %v490_v45  ;;  %1185 = vmatpush.msra.mxu2 %v558_v46  ;;  %v614_v1 = vld [vmem:[#allocation5 + $0xb98] sm:$0xff]  ;;  %v701_v46 = vpop.f32.mrf.mxu0 }
 0x10d   :  { %1137 = vmatpush.msra.mxu0 %v318_v14  ;;  %1147 = vmatpush.msrb.mxu1 %v422_v20  ;;  %v398_v2 = vld [vmem:[#allocation5 + $0x4d8] sm:$0xff] }
 0x10e   :  { %1167 = vmatpush.msrb.mxu3 %v486_v47  ;;  %1186 = vmatpush.msra.mxu2 %v554_v48  ;;  %v462_v3 = vld [vmem:[#allocation5 + $0x6d8] sm:$0xff]  ;;  %v1820_v47 = vld.sshfl [vmem:[#allocation1 + $0x8] sm:$0xff pattern:$0x73625140] }
 0x10f   :  { %1785 = vmatmul.msk.f32.vlgmr.msrb.gmra.mxu0 %vm681_vm0, %v2322_v8  ;;  %1148 = vmatpush.msrb.mxu1 %v418_v50  ;;  %v470_v8 = vld [vmem:[#allocation5 + $0x718] sm:$0xff]  ;;  %v1822_v50 = vld.sshfl [vmem:[#allocation1 + $0x20] sm:$0xff pattern:$0x73625140] }
 0x110   :  { %1138 = vmatpush.msra.mxu0 %v314_v49  ;;  %1168 = vmatpush.msrb.mxu3 %v482_v51  ;;  %v530_v13 = vld [vmem:[#allocation5 + $0x8f8] sm:$0xff]  ;;  %v1821_v49 = vld.sshfl [vmem:[#allocation1 + $0x10] sm:$0xff pattern:$0x73625140]  ;;  %v1308_v51 = vld [vmem:[#allocation8 + $0x1e0] sm:$0xff] }
 0x111   :  { %1187 = vmatpush.msra.mxu2 %v550_v23  ;;  %1149 = vmatpush.msrb.mxu1 %v414_v53  ;;  %v610_v4 = vld [vmem:[#allocation5 + $0xb78] sm:$0xff]  ;;  %v1272_v53 = vld [vmem:[#allocation8 + $0xc0] sm:$0xff] }
 0x112   :  { %1139 = vmatpush.msra.mxu0 %v310_v52  ;;  %1169 = vmatpush.msrb.mxu3 %v478_v54  ;;  %v394_v5 = vld [vmem:[#allocation5 + $0x4b8] sm:$0xff]  ;;  %v702_v52 = vadd.f32 %v701_v46, %v637_v44  ;;  %v721_v54 = vpop.f32.mrf.mxu1  ;;  %v1336_v44 = vld [vmem:[#allocation8 + $0x2c0] sm:$0xff] }
 0x113   :  { %1188 = vmatpush.msra.mxu2 %v546_v55  ;;  %1150 = vmatpush.msrb.mxu1 %v410_v57  ;;  %v458_v6 = vld [vmem:[#allocation5 + $0x6b8] sm:$0xff]  ;;  %v741_v55 = vpop.f32.mrf.mxu2 }
 0x114   :  { %1204 = vmatpush.msrb.mxu0 %v626_v56  ;;  %1170 = vmatpush.msrb.mxu3 %v474_v17  ;;  %v526_v7 = vld [vmem:[#allocation5 + $0x8d8] sm:$0xff] }
 0x115   :  { %1189 = vmatpush.msra.mxu2 %v542_v58  ;;  %1151 = vmatpush.msrb.mxu1 %v406_v59  ;;  %v606_v9 = vld [vmem:[#allocation5 + $0xb58] sm:$0xff]  ;;  %v1304_v58 = vld [vmem:[#allocation8 + $0x1c0] sm:$0xff]  ;;  %v722_v59 = vadd.f32 %v721_v54, %v702_v52  ;;  %v1277_v52 = vld [vmem:[#allocation8 + $0xe8] sm:$0xff] }
 0x116   :  { %1205 = vmatpush.msrb.mxu0 %v622_v18  ;;  %1171 = vmatpush.msrb.mxu3 %v470_v8  ;;  %v390_v10 = vld [vmem:[#allocation5 + $0x498] sm:$0xff]  ;;  %v1268_v8 = vld [vmem:[#allocation8 + $0xa0] sm:$0xff] }
 0x117   :  { %1190 = vmatpush.msra.mxu2 %v538_v60  ;;  %1152 = vmatpush.msrb.mxu1 %v402_v62  ;;  %v454_v11 = vld [vmem:[#allocation5 + $0x698] sm:$0xff] }
 0x118   :  { %1206 = vmatpush.msrb.mxu0 %v618_v61  ;;  %1172 = vmatpush.msrb.mxu3 %v466_v63  ;;  %v522_v12 = vld [vmem:[#allocation5 + $0x8b8] sm:$0xff]  ;;  %v761_v61 = vpop.f32.mrf.mxu3  ;;  %v1823_v63 = vld.sshfl [vmem:[#allocation1 + $0x28] sm:$0xff pattern:$0x73625140] }
 0x119   :  { %1191 = vmatpush.msra.mxu2 %v534_v0  ;;  %1153 = vmatpush.msrb.mxu1 %v398_v2  ;;  %v602_v15 = vld [vmem:[#allocation5 + $0xb38] sm:$0xff]  ;;  %v1300_v0 = vld [vmem:[#allocation8 + $0x1a0] sm:$0xff] }
 0x11a   :  { %1207 = vmatpush.msrb.mxu0 %v614_v1  ;;  %1173 = vmatpush.msrb.mxu3 %v462_v3  ;;  %v386_v16 = vld [vmem:[#allocation5 + $0x478] sm:$0xff]  ;;  %v742_v1 = vadd.f32 %v741_v55, %v722_v59  ;;  %v1264_v2 = vld [vmem:[#allocation8 + $0x80] sm:$0xff]  ;;  %v1273_v59 = vld [vmem:[#allocation8 + $0xc8] sm:$0xff] }
 0x11b   :  { %1192 = vmatpush.msra.mxu2 %v530_v13  ;;  %1154 = vmatpush.msrb.mxu1 %v394_v5  ;;  %v450_v19 = vld [vmem:[#allocation5 + $0x678] sm:$0xff]  ;;  %v1824_v13 = vld.sshfl [vmem:[#allocation1 + $0x30] sm:$0xff pattern:$0x73625140]  ;;  %v1332_v55 = vld [vmem:[#allocation8 + $0x2a0] sm:$0xff] }
 0x11c   :  { %1208 = vmatpush.msrb.mxu0 %v610_v4  ;;  %1174 = vmatpush.msrb.mxu3 %v458_v6  ;;  %v518_v21 = vld [vmem:[#allocation5 + $0x898] sm:$0xff]  ;;  %v781_v6 = vpop.f32.mrf.mxu0 }
 0x11d   :  { %1193 = vmatpush.msra.mxu2 %v526_v7  ;;  %1155 = vmatpush.msrb.mxu1 %v390_v10  ;;  %v598_v22 = vld [vmem:[#allocation5 + $0xb18] sm:$0xff]  ;;  %v1296_v7 = vld [vmem:[#allocation8 + $0x180] sm:$0xff]  ;;  %v762_v10 = vadd.f32 %v761_v61, %v742_v1 }
 0x11e   :  { %1209 = vmatpush.msrb.mxu0 %v606_v9  ;;  %1175 = vmatpush.msrb.mxu3 %v454_v11  ;;  %v382_v24 = vld [vmem:[#allocation5 + $0x458] sm:$0xff]  ;;  %v638_v9 = vperm.slane %v2348_v39, 1  ;;  %v1260_v11 = vld [vmem:[#allocation8 + $0x60] sm:$0xff] }
 0x11f   :  { %1194 = vmatpush.msra.mxu2 %v522_v12  ;;  %1156 = vmatpush.msrb.mxu1 %v386_v16  ;;  %v446_v25 = vld [vmem:[#allocation5 + $0x658] sm:$0xff]  ;;  %v821_v3 = vpop.f32.mrf.mxu2  ;;  %v1324_v1 = vld [vmem:[#allocation8 + $0x260] sm:$0xff] }
 0x120   :  { %1210 = vmatpush.msrb.mxu0 %v602_v15  ;;  %1176 = vmatpush.msrb.mxu3 %v450_v19  ;;  %v514_v26 = vld [vmem:[#allocation5 + $0x878] sm:$0xff]  ;;  %v782_v15 = vadd.f32 %v781_v6, %v762_v10  ;;  %v1265_v10 = vld [vmem:[#allocation8 + $0x88] sm:$0xff] }
 0x121   :  { %1195 = vmatpush.msra.mxu2 %v518_v21  ;;  %v594_v27 = vld [vmem:[#allocation5 + $0xaf8] sm:$0xff]  ;;  %1157 = vmatpush.msrb.mxu1 %v382_v24  ;;  %v801_v21 = vpop.f32.mrf.mxu1 }
 0x122   :  { %1211 = vmatpush.msrb.mxu0 %v598_v22  ;;  %1120 = vmatmul.f32.vlgmr.msrb.gmra.mxu2 %v1818_v28  ;;  %v378_v29 = vld [vmem:[#allocation5 + $0x438] sm:$0xff]  ;;  %v1292_v22 = vld [vmem:[#allocation8 + $0x160] sm:$0xff] }
 0x123   :  { %v442_v30 = vld [vmem:[#allocation5 + $0x638] sm:$0xff]  ;;  %1177 = vmatpush.msrb.mxu3 %v446_v25  ;;  %1196 = vmatpush.msra.mxu2 %v514_v26  ;;  %v1256_v25 = vld [vmem:[#allocation8 + $0x40] sm:$0xff] }
 0x124   :  { %v510_v31 = vld [vmem:[#allocation5 + $0x858] sm:$0xff]  ;;  %1212 = vmatpush.msrb.mxu0 %v594_v27  ;;  %1158 = vmatpush.msrb.mxu1 %v378_v29  ;;  %v802_v29 = vadd.f32 %v801_v21, %v782_v15  ;;  %v1316_v21 = vld [vmem:[#allocation8 + $0x220] sm:$0xff] }
 0x125   :  { %v590_v32 = vld [vmem:[#allocation5 + $0xad8] sm:$0xff]  ;;  %1178 = vmatpush.msrb.mxu3 %v442_v30  ;;  %1197 = vmatpush.msra.mxu2 %v510_v31 }
 0x126   :  { %v374_v33 = vld [vmem:[#allocation5 + $0x418] sm:$0xff]  ;;  %1213 = vmatpush.msrb.mxu0 %v590_v32  ;;  %v1288_v32 = vld [vmem:[#allocation8 + $0x140] sm:$0xff] }
 0x127   :  { %v438_v34 = vld [vmem:[#allocation5 + $0x618] sm:$0xff]  ;;  %1159 = vmatpush.msrb.mxu1 %v374_v33  ;;  %1140 = vmatmul.f32.vlgmr.msra.gmra.mxu0 %v1820_v47  ;;  %v1340_v33 = vld [vmem:[#allocation8 + $0x2e0] sm:$0xff] }
 0x128   :  { %v506_v35 = vld [vmem:[#allocation5 + $0x838] sm:$0xff]  ;;  %1179 = vmatpush.msrb.mxu3 %v438_v34  ;;  %1160 = vmatmul.f32.vlgmr.msrb.gmra.mxu1 %v1821_v49  ;;  %v1252_v34 = vld [vmem:[#allocation8 + $0x20] sm:$0xff] }
 0x129   :  { %v586_v36 = vld [vmem:[#allocation5 + $0xab8] sm:$0xff]  ;;  %1198 = vmatpush.msra.mxu2 %v506_v35 }
 0x12a   :  { %v634_v37 = vld [vmem:[#allocation5 + $0xc38] sm:$0xff]  ;;  %1214 = vmatpush.msrb.mxu0 %v586_v36 }
 0x12b   :  { %v1278_v38 = vld [vmem:[#allocation8 + $0xf0] sm:$0xff]  ;;  %1238 = vmatpush.msra.mxu1 %v634_v37  ;;  %v1279_v49 = vld [vmem:[#allocation8 + $0xf8] sm:$0xff] }
 0x12c   :  { %v502_v40 = vld [vmem:[#allocation5 + $0x818] sm:$0xff]  ;;  %1382 = vmatpush.msra.mxu3 %v1278_v38  ;;  %v2353_v38 = vadd.f32 %v821_v3, %v802_v29  ;;  %v1257_v29 = vld [vmem:[#allocation8 + $0x48] sm:$0xff] }
 0x12d   :  { %v582_v41 = vld [vmem:[#allocation5 + $0xa98] sm:$0xff]  ;;  %1199 = vmatpush.msra.mxu2 %v502_v40 }
 0x12e   :  { %v630_v42 = vld [vmem:[#allocation5 + $0xc18] sm:$0xff]  ;;  %1215 = vmatpush.msrb.mxu0 %v582_v41  ;;  %1383 = vmatpush.msra.mxu3 %v1276_v43 }
 0x12f   :  { %v1819_v45 = vld.sshfl [vmem:[#allocation1 + $0x18] sm:$0xff pattern:$0x73625140]  ;;  %1239 = vmatpush.msra.mxu1 %v630_v42  ;;  %1200 = vmatmul.f32.vlgmr.msra.gmra.mxu2 %v1822_v50  ;;  %v1284_v42 = vld [vmem:[#allocation8 + $0x120] sm:$0xff] }
 0x130   :  { %1180 = vmatmul.f32.vlgmr.msrb.gmra.mxu3 %v1819_v45  ;;  %v1310_v14 = vld [vmem:[#allocation8 + $0x1f0] sm:$0xff]  ;;  %1786 = vmatmul.msk.f32.vlgmr.msra.gmra.mxu1 %vm681_vm0, %v1824_v13  ;;  %v1248_v45 = vld [vmem:[#allocation8] sm:$0xff]  ;;  %v1303_v3 = vld [vmem:[#allocation8 + $0x1b8] sm:$0xff] }
 0x131   :  { %v578_v20 = vld [vmem:[#allocation5 + $0xa78] sm:$0xff]  ;;  %1402 = vmatpush.msrb.mxu1 %v1310_v14 }
 0x132   :  { %v1274_v48 = vld [vmem:[#allocation8 + $0xd0] sm:$0xff]  ;;  %1216 = vmatpush.msrb.mxu0 %v578_v20 }
 0x133   :  { %v574_v23 = vld [vmem:[#allocation5 + $0xa58] sm:$0xff]  ;;  %1384 = vmatpush.msra.mxu3 %v1274_v48  ;;  %1403 = vmatpush.msrb.mxu1 %v1308_v51  ;;  %v1244_v48 = vmax.f32 %v2353_v38, 0.0  ;;  %v1280_v51 = vld [vmem:[#allocation8 + $0x100] sm:$0xff] }
 0x134   :  { %v1306_v56 = vld [vmem:[#allocation8 + $0x1d0] sm:$0xff]  ;;  %1217 = vmatpush.msrb.mxu0 %v574_v23  ;;  %v1356_v38 = vld [vmem:[#allocation8 + $0x360] sm:$0xff] }
 0x135   :  { %v570_v57 = vld [vmem:[#allocation5 + $0xa38] sm:$0xff]  ;;  %1385 = vmatpush.msra.mxu3 %v1272_v53  ;;  %1404 = vmatpush.msrb.mxu1 %v1306_v56 }
 0x136   :  { %v1270_v17 = vld [vmem:[#allocation8 + $0xb0] sm:$0xff]  ;;  %1218 = vmatpush.msrb.mxu0 %v570_v57  ;;  %v1311_v53 = vld [vmem:[#allocation8 + $0x1f8] sm:$0xff] }
 0x137   :  { %v566_v18 = vld [vmem:[#allocation5 + $0xa18] sm:$0xff]  ;;  %1386 = vmatpush.msra.mxu3 %v1270_v17  ;;  %1405 = vmatpush.msrb.mxu1 %v1304_v58  ;;  %v1309_v17 = vld [vmem:[#allocation8 + $0x1e8] sm:$0xff] }
 0x138   :  { %v1302_v60 = vld [vmem:[#allocation8 + $0x1b0] sm:$0xff]  ;;  %1219 = vmatpush.msrb.mxu0 %v566_v18  ;;  %v1275_v57 = vld [vmem:[#allocation8 + $0xd8] sm:$0xff]  ;;  %v1328_v18 = vld [vmem:[#allocation8 + $0x280] sm:$0xff] }
 0x139   :  { %v1266_v62 = vld [vmem:[#allocation8 + $0x90] sm:$0xff]  ;;  %1387 = vmatpush.msra.mxu3 %v1268_v8  ;;  %1220 = vmatmul.f32.vlgmr.msrb.gmra.mxu0 %v1823_v63  ;;  %v1307_v8 = vld [vmem:[#allocation8 + $0x1d8] sm:$0xff]  ;;  %v1305_v63 = vld [vmem:[#allocation8 + $0x1c8] sm:$0xff] }
 0x13a   :  { %1406 = vmatpush.msrb.mxu1 %v1302_v60  ;;  %v1298_v4 = vld [vmem:[#allocation8 + $0x190] sm:$0xff] }
 0x13b   :  { %1388 = vmatpush.msra.mxu3 %v1266_v62  ;;  %v1262_v5 = vld [vmem:[#allocation8 + $0x70] sm:$0xff]  ;;  %v841_v19 = vpop.f32.mrf.mxu3  ;;  %v1271_v62 = vld [vmem:[#allocation8 + $0xb8] sm:$0xff] }
 0x13c   :  { %1407 = vmatpush.msrb.mxu1 %v1300_v0  ;;  %v1294_v12 = vld [vmem:[#allocation8 + $0x170] sm:$0xff]  ;;  %v842_v24 = vadd.f32 %v841_v19, %v638_v9  ;;  %v1372_v9 = vld [vmem:[#allocation8 + $0x3e0] sm:$0xff]  ;;  %v1297_v19 = vld [vmem:[#allocation8 + $0x188] sm:$0xff] }
 0x13d   :  { %1389 = vmatpush.msra.mxu3 %v1264_v2  ;;  %v1258_v16 = vld [vmem:[#allocation8 + $0x50] sm:$0xff]  ;;  %v1269_v2 = vld [vmem:[#allocation8 + $0xa8] sm:$0xff] }
 0x13e   :  { %1408 = vmatpush.msrb.mxu1 %v1298_v4  ;;  %v1290_v26 = vld [vmem:[#allocation8 + $0x150] sm:$0xff]  ;;  %v861_v27 = vpop.f32.mrf.mxu2  ;;  %v1267_v4 = vld [vmem:[#allocation8 + $0x98] sm:$0xff] }
 0x13f   :  { %1390 = vmatpush.msra.mxu3 %v1262_v5  ;;  %v1342_v28 = vld [vmem:[#allocation8 + $0x2f0] sm:$0xff]  ;;  %v862_v31 = vadd.f32 %v861_v27, %v842_v24  ;;  %v1301_v5 = vld [vmem:[#allocation8 + $0x1a8] sm:$0xff]  ;;  %v1295_v24 = vld [vmem:[#allocation8 + $0x178] sm:$0xff] }
 0x140   :  { %1409 = vmatpush.msrb.mxu1 %v1296_v7  ;;  %v1254_v30 = vld [vmem:[#allocation8 + $0x30] sm:$0xff]  ;;  %1422 = vmatpush.msrb.mxu2 %v1342_v28  ;;  %v1320_v7 = vld [vmem:[#allocation8 + $0x240] sm:$0xff]  ;;  %v1293_v27 = vld [vmem:[#allocation8 + $0x168] sm:$0xff] }
 0x141   :  { %1391 = vmatpush.msra.mxu3 %v1260_v11  ;;  %v1286_v35 = vld [vmem:[#allocation8 + $0x130] sm:$0xff]  ;;  %v881_v36 = vpop.f32.mrf.mxu0  ;;  %v1299_v11 = vld [vmem:[#allocation8 + $0x198] sm:$0xff]  ;;  %v1312_v28 = vld [vmem:[#allocation8 + $0x200] sm:$0xff] }
 0x142   :  { %1410 = vmatpush.msrb.mxu1 %v1294_v12  ;;  %1423 = vmatpush.msrb.mxu2 %v1340_v33  ;;  %v1338_v37 = vld [vmem:[#allocation8 + $0x2d0] sm:$0xff]  ;;  %v882_v41 = vadd.f32 %v881_v36, %v862_v31  ;;  %v1343_v31 = vld [vmem:[#allocation8 + $0x2f8] sm:$0xff]  ;;  %v1289_v33 = vld [vmem:[#allocation8 + $0x148] sm:$0xff] }
 0x143   :  { %1392 = vmatpush.msra.mxu3 %v1258_v16  ;;  %v1250_v40 = vld [vmem:[#allocation8 + $0x10] sm:$0xff]  ;;  %v1263_v16 = vld [vmem:[#allocation8 + $0x78] sm:$0xff] }
 0x144   :  { %1411 = vmatpush.msrb.mxu1 %v1292_v22  ;;  %1424 = vmatpush.msrb.mxu2 %v1338_v37  ;;  %v901_v43 = vpop.f32.mrf.mxu1  ;;  %v1282_v14 = vld [vmem:[#allocation8 + $0x110] sm:$0xff]  ;;  %v1261_v22 = vld [vmem:[#allocation8 + $0x68] sm:$0xff]  ;;  %v1287_v36 = vld [vmem:[#allocation8 + $0x138] sm:$0xff] }
 0x145   :  { %1393 = vmatpush.msra.mxu3 %v1256_v25  ;;  %v902_v46 = vadd.f32 %v901_v43, %v882_v41  ;;  %v921_v20 = vpop.f32.mrf.mxu3  ;;  %v1334_v47 = vld [vmem:[#allocation8 + $0x2b0] sm:$0xff]  ;;  %v1339_v37 = vld [vmem:[#allocation8 + $0x2d8] sm:$0xff]  ;;  %v1285_v41 = vld [vmem:[#allocation8 + $0x128] sm:$0xff] }
 0x146   :  { %1412 = vmatpush.msrb.mxu1 %v1290_v26  ;;  %1425 = vmatpush.msrb.mxu2 %v1336_v44  ;;  %v1330_v56 = vld [vmem:[#allocation8 + $0x290] sm:$0xff]  ;;  %v1259_v26 = vld [vmem:[#allocation8 + $0x58] sm:$0xff]  ;;  %v1337_v43 = vld [vmem:[#allocation8 + $0x2c8] sm:$0xff] }
 0x147   :  { %1394 = vmatpush.msra.mxu3 %v1254_v30  ;;  %v922_v50 = vadd.f32 %v921_v20, %v902_v46  ;;  %v1326_v61 = vld [vmem:[#allocation8 + $0x270] sm:$0xff]  ;;  %v1291_v30 = vld [vmem:[#allocation8 + $0x158] sm:$0xff]  ;;  %v1281_v20 = vld [vmem:[#allocation8 + $0x108] sm:$0xff] }
 0x148   :  { %1413 = vmatpush.msrb.mxu1 %v1288_v32  ;;  %1426 = vmatpush.msrb.mxu2 %v1334_v47  ;;  %v941_v23 = vpop.f32.mrf.mxu2  ;;  %v1322_v13 = vld [vmem:[#allocation8 + $0x250] sm:$0xff]  ;;  %v1255_v32 = vld [vmem:[#allocation8 + $0x38] sm:$0xff]  ;;  %v1364_v47 = vld [vmem:[#allocation8 + $0x3a0] sm:$0xff] }
 0x149   :  { %1395 = vmatpush.msra.mxu3 %v1252_v34  ;;  %v942_v54 = vadd.f32 %v941_v23, %v922_v50  ;;  %v1374_v6 = vld [vmem:[#allocation8 + $0x3f0] sm:$0xff]  ;;  %v1341_v34 = vld [vmem:[#allocation8 + $0x2e8] sm:$0xff]  ;;  %v1283_v46 = vld [vmem:[#allocation8 + $0x118] sm:$0xff] }
 0x14a   :  { %1414 = vmatpush.msrb.mxu1 %v1286_v35  ;;  %1427 = vmatpush.msrb.mxu2 %v1332_v55  ;;  %v1318_v12 = vld [vmem:[#allocation8 + $0x230] sm:$0xff]  ;;  %v1253_v35 = vld [vmem:[#allocation8 + $0x28] sm:$0xff] }
 0x14b   :  { %1396 = vmatpush.msra.mxu3 %v1250_v40  ;;  %v961_v58 = vpop.f32.mrf.mxu0  ;;  %1442 = vmatpush.msra.mxu0 %v1374_v6  ;;  %v1370_v15 = vld [vmem:[#allocation8 + $0x3d0] sm:$0xff]  ;;  %v1251_v40 = vld [vmem:[#allocation8 + $0x18] sm:$0xff]  ;;  %v1329_v23 = vld [vmem:[#allocation8 + $0x288] sm:$0xff] }
 0x14c   :  { %1415 = vmatpush.msrb.mxu1 %v1284_v42  ;;  %v2358_v60 = vadd.f32 %v961_v58, %v942_v54  ;;  %1428 = vmatpush.msrb.mxu2 %v1330_v56  ;;  %v1314_v25 = vld [vmem:[#allocation8 + $0x210] sm:$0xff]  ;;  %v1368_v42 = vld [vmem:[#allocation8 + $0x3c0] sm:$0xff]  ;;  %v1325_v55 = vld [vmem:[#allocation8 + $0x268] sm:$0xff]  ;;  %v639_v58 = vperm.slane %v2348_v39, 2 }
 0x14d   :  { %1397 = vmatpush.msra.mxu3 %v1248_v45  ;;  %1443 = vmatpush.msra.mxu0 %v1372_v9  ;;  %v1366_v44 = vld [vmem:[#allocation8 + $0x3b0] sm:$0xff]  ;;  %v1249_v45 = vld [vmem:[#allocation8 + $0x8] sm:$0xff]  ;;  %v1371_v9 = vld [vmem:[#allocation8 + $0x3d8] sm:$0xff] }
 0x14e   :  { %1398 = vmatmul.f32.vlgmr.msra.gmra.mxu3 %v1244_v48  ;;  %1416 = vmatpush.msrb.mxu1 %v1282_v14  ;;  %v1245_v0 = vmax.f32 %v2358_v60, 0.0  ;;  %v1335_v14 = vld [vmem:[#allocation8 + $0x2b8] sm:$0xff]  ;;  %v1362_v50 = vld [vmem:[#allocation8 + $0x390] sm:$0xff]  ;;  %v1317_v60 = vld [vmem:[#allocation8 + $0x228] sm:$0xff] }
 0x14f   :  { %1462 = vmatpush.msrb.mxu3 %v1279_v49  ;;  %1429 = vmatpush.msrb.mxu2 %v1328_v18  ;;  %v1333_v49 = vld [vmem:[#allocation8 + $0x2a8] sm:$0xff]  ;;  %v1358_v54 = vld [vmem:[#allocation8 + $0x370] sm:$0xff] }
 0x150   :  { %1417 = vmatpush.msrb.mxu1 %v1280_v51  ;;  %1444 = vmatpush.msra.mxu0 %v1370_v15  ;;  %v1331_v51 = vld [vmem:[#allocation8 + $0x298] sm:$0xff]  ;;  %v1354_v56 = vld [vmem:[#allocation8 + $0x350] sm:$0xff]  ;;  %v1373_v6 = vld [vmem:[#allocation8 + $0x3e8] sm:$0xff] }
 0x151   :  { %1463 = vmatpush.msrb.mxu3 %v1277_v52  ;;  %1418 = vmatmul.f32.vlgmr.msrb.gmra.mxu1 %v1245_v0  ;;  %v1327_v52 = vld [vmem:[#allocation8 + $0x278] sm:$0xff]  ;;  %v1369_v15 = vld [vmem:[#allocation8 + $0x3c8] sm:$0xff] }
 0x152   :  { %1482 = vmatpush.msra.mxu1 %v1311_v53  ;;  %1430 = vmatpush.msrb.mxu2 %v1326_v61  ;;  %v1360_v53 = vld [vmem:[#allocation8 + $0x380] sm:$0xff] }
 0x153   :  { %1464 = vmatpush.msrb.mxu3 %v1275_v57  ;;  %1445 = vmatpush.msra.mxu0 %v1368_v42  ;;  %v1321_v57 = vld [vmem:[#allocation8 + $0x248] sm:$0xff]  ;;  %v1348_v61 = vld [vmem:[#allocation8 + $0x320] sm:$0xff] }
 0x154   :  { %1483 = vmatpush.msra.mxu1 %v1309_v17  ;;  %1431 = vmatpush.msrb.mxu2 %v1324_v1  ;;  %v1352_v17 = vld [vmem:[#allocation8 + $0x340] sm:$0xff]  ;;  %v1346_v1 = vld [vmem:[#allocation8 + $0x310] sm:$0xff] }
 0x155   :  { %1465 = vmatpush.msrb.mxu3 %v1273_v59  ;;  %1446 = vmatpush.msra.mxu0 %v1366_v44  ;;  %v1319_v59 = vld [vmem:[#allocation8 + $0x238] sm:$0xff] }
 0x156   :  { %1484 = vmatpush.msra.mxu1 %v1307_v8  ;;  %1432 = vmatpush.msrb.mxu2 %v1322_v13  ;;  %v1350_v8 = vld [vmem:[#allocation8 + $0x330] sm:$0xff] }
 0x157   :  { %1466 = vmatpush.msrb.mxu3 %v1271_v62  ;;  %1447 = vmatpush.msra.mxu0 %v1364_v47 }
 0x158   :  { %1485 = vmatpush.msra.mxu1 %v1305_v63  ;;  %1433 = vmatpush.msrb.mxu2 %v1320_v7 }
 0x159   :  { %1467 = vmatpush.msrb.mxu3 %v1269_v2  ;;  %1448 = vmatpush.msra.mxu0 %v1362_v50  ;;  %v1313_v2 = vld [vmem:[#allocation8 + $0x208] sm:$0xff] }
 0x15a   :  { %1486 = vmatpush.msra.mxu1 %v1303_v3  ;;  %1434 = vmatpush.msrb.mxu2 %v1318_v12  ;;  %v1344_v3 = vld [vmem:[#allocation8 + $0x300] sm:$0xff] }
 0x15b   :  { %1468 = vmatpush.msrb.mxu3 %v1267_v4  ;;  %1449 = vmatpush.msra.mxu0 %v1360_v53  ;;  %v1375_v4 = vld [vmem:[#allocation8 + $0x3f8] sm:$0xff] }
 0x15c   :  { %1487 = vmatpush.msra.mxu1 %v1301_v5  ;;  %1435 = vmatpush.msrb.mxu2 %v1316_v21 }
 0x15d   :  { %1469 = vmatpush.msrb.mxu3 %v1265_v10  ;;  %1450 = vmatpush.msra.mxu0 %v1358_v54  ;;  %v1559_v54 = vld [vmem:[#allocation11 + $0x78] sm:$0xff] }
 0x15e   :  { %1488 = vmatpush.msra.mxu1 %v1299_v11  ;;  %1436 = vmatpush.msrb.mxu2 %v1314_v25  ;;  %v1365_v25 = vld [vmem:[#allocation8 + $0x3a8] sm:$0xff] }
 0x15f   :  { %1470 = vmatpush.msrb.mxu3 %v1263_v16  ;;  %1451 = vmatpush.msra.mxu0 %v1356_v38  ;;  %v1556_v38 = vld [vmem:[#allocation11 + $0x60] sm:$0xff] }
 0x160   :  { %1489 = vmatpush.msra.mxu1 %v1297_v19  ;;  %1437 = vmatpush.msrb.mxu2 %v1312_v28 }
 0x161   :  { %1471 = vmatpush.msrb.mxu3 %v1261_v22  ;;  %1452 = vmatpush.msra.mxu0 %v1354_v56  ;;  %v1367_v22 = vld [vmem:[#allocation8 + $0x3b8] sm:$0xff] }
 0x162   :  { %1490 = vmatpush.msra.mxu1 %v1295_v24  ;;  %1502 = vmatpush.msra.mxu2 %v1343_v31  ;;  %v1357_v31 = vld [vmem:[#allocation8 + $0x368] sm:$0xff]  ;;  %v1574_v56 = vld [vmem:[#allocation11 + $0xf0] sm:$0xff] }
 0x163   :  { %1472 = vmatpush.msrb.mxu3 %v1259_v26  ;;  %1453 = vmatpush.msra.mxu0 %v1352_v17  ;;  %v1573_v17 = vld [vmem:[#allocation11 + $0xe8] sm:$0xff] }
 0x164   :  { %1491 = vmatpush.msra.mxu1 %v1293_v27  ;;  %1503 = vmatpush.msra.mxu2 %v1341_v34  ;;  %v1363_v27 = vld [vmem:[#allocation8 + $0x398] sm:$0xff] }
 0x165   :  { %1473 = vmatpush.msrb.mxu3 %v1257_v29  ;;  %1454 = vmatpush.msra.mxu0 %v1350_v8  ;;  %v1361_v29 = vld [vmem:[#allocation8 + $0x388] sm:$0xff]  ;;  %v1351_v34 = vld [vmem:[#allocation8 + $0x338] sm:$0xff] }
 0x166   :  { %1492 = vmatpush.msra.mxu1 %v1291_v30  ;;  %1504 = vmatpush.msra.mxu2 %v1339_v37  ;;  %v1359_v30 = vld [vmem:[#allocation8 + $0x378] sm:$0xff]  ;;  %v1345_v37 = vld [vmem:[#allocation8 + $0x308] sm:$0xff] }
 0x167   :  { %1474 = vmatpush.msrb.mxu3 %v1255_v32  ;;  %v981_v18 = vpop.f32.mrf.mxu1  ;;  %1455 = vmatpush.msra.mxu0 %v1348_v61  ;;  %v1355_v32 = vld [vmem:[#allocation8 + $0x358] sm:$0xff] }
 0x168   :  { %1493 = vmatpush.msra.mxu1 %v1289_v33  ;;  %1505 = vmatpush.msra.mxu2 %v1337_v43  ;;  %v982_v62 = vadd.f32 %v981_v18, %v639_v58  ;;  %v1353_v33 = vld [vmem:[#allocation8 + $0x348] sm:$0xff]  ;;  %v1554_v58 = vld [vmem:[#allocation11 + $0x50] sm:$0xff]  ;;  %v1571_v8 = vld [vmem:[#allocation11 + $0xd8] sm:$0xff] }
 0x169   :  { %1475 = vmatpush.msrb.mxu3 %v1253_v35  ;;  %v1001_v63 = vpop.f32.mrf.mxu3  ;;  %1456 = vmatpush.msra.mxu0 %v1346_v1  ;;  %v1349_v35 = vld [vmem:[#allocation8 + $0x328] sm:$0xff]  ;;  %v1570_v61 = vld [vmem:[#allocation11 + $0xd0] sm:$0xff] }
 0x16a   :  { %1494 = vmatpush.msra.mxu1 %v1287_v36  ;;  %1506 = vmatpush.msra.mxu2 %v1335_v14  ;;  %v1002_v13 = vadd.f32 %v1001_v63, %v982_v62  ;;  %v1021_v5 = vpop.f32.mrf.mxu0  ;;  %v1347_v36 = vld [vmem:[#allocation8 + $0x318] sm:$0xff]  ;;  %v1572_v18 = vld [vmem:[#allocation11 + $0xe0] sm:$0xff]  ;;  %v1569_v63 = vld [vmem:[#allocation11 + $0xc8] sm:$0xff] }
 0x16b   :  { %1476 = vmatpush.msrb.mxu3 %v1251_v40  ;;  %1457 = vmatpush.msra.mxu0 %v1344_v3  ;;  %v640_v40 = vperm.slane %v2348_v39, 3  ;;  %v1558_v39 = vld [vmem:[#allocation11 + $0x70] sm:$0xff]  ;;  %v1551_v62 = vld [vmem:[#allocation11 + $0x38] sm:$0xff]  ;;  %v1568_v1 = vld [vmem:[#allocation11 + $0xc0] sm:$0xff] }
 0x16c   :  { %1495 = vmatpush.msra.mxu1 %v1285_v41  ;;  %1507 = vmatpush.msra.mxu2 %v1333_v49  ;;  %v1022_v7 = vadd.f32 %v1021_v5, %v1002_v13  ;;  %v1567_v3 = vld [vmem:[#allocation11 + $0xb8] sm:$0xff]  ;;  %v1548_v13 = vld [vmem:[#allocation11 + $0x20] sm:$0xff]  ;;  %v1546_v5 = vld [vmem:[#allocation11 + $0x10] sm:$0xff] }
 0x16d   :  { %1477 = vmatpush.msrb.mxu3 %v1249_v45  ;;  %1522 = vmatpush.msrb.mxu0 %v1375_v4  ;;  %v1547_v4 = vld [vmem:[#allocation11 + $0x18] sm:$0xff] }
 0x16e   :  { %1496 = vmatpush.msra.mxu1 %v1283_v46  ;;  %1478 = vmatmul.f32.vlgmr.msrb.gmra.mxu3 %v1244_v48  ;;  %v1323_v48 = vld [vmem:[#allocation8 + $0x258] sm:$0xff]  ;;  %v1041_v10 = vpop.f32.mrf.mxu2 }
 0x16f   :  { %1508 = vmatpush.msra.mxu2 %v1331_v51  ;;  %1523 = vmatpush.msrb.mxu0 %v1373_v6  ;;  %v1042_v12 = vadd.f32 %v1041_v10, %v1022_v7  ;;  %v1566_v6 = vld [vmem:[#allocation11 + $0xb0] sm:$0xff]  ;;  %v1545_v7 = vld [vmem:[#allocation11 + $0x8] sm:$0xff]  ;;  %v1544_v10 = vld [vmem:[#allocation11] sm:$0xff] }
 0x170   :  { %1497 = vmatpush.msra.mxu1 %v1281_v20  ;;  %1580 = vmatpush.msra.mxu3 %v1559_v54 }
 0x171   :  { %1498 = vmatmul.f32.vlgmr.msra.gmra.mxu1 %v1245_v0  ;;  %1509 = vmatpush.msra.mxu2 %v1329_v23  ;;  %v1315_v0 = vld [vmem:[#allocation8 + $0x218] sm:$0xff] }
 0x172   :  { %1524 = vmatpush.msrb.mxu0 %v1371_v9  ;;  %1581 = vmatpush.msra.mxu3 %v1558_v39  ;;  %v1565_v9 = vld [vmem:[#allocation11 + $0xa8] sm:$0xff]  ;;  %v1624_v39 = vld [vmem:[#allocation14 + $0x18] sm:$0xff] }
 0x173   :  { %1510 = vmatpush.msra.mxu2 %v1327_v52 }
 0x174   :  { %1525 = vmatpush.msrb.mxu0 %v1369_v15  ;;  %v1562_v15 = vld [vmem:[#allocation11 + $0x90] sm:$0xff] }
 0x175   :  { %1511 = vmatpush.msra.mxu2 %v1325_v55  ;;  %v1557_v55 = vld [vmem:[#allocation11 + $0x68] sm:$0xff] }
 0x176   :  { %1526 = vmatpush.msrb.mxu0 %v1367_v22  ;;  %1582 = vmatpush.msra.mxu3 %v1557_v55  ;;  %v1635_v22 = vld [vmem:[#allocation14 + $0x70] sm:$0xff] }
 0x177   :  { %1512 = vmatpush.msra.mxu2 %v1323_v48  ;;  %v1575_v48 = vld [vmem:[#allocation11 + $0xf8] sm:$0xff] }
 0x178   :  { %1527 = vmatpush.msrb.mxu0 %v1365_v25  ;;  %1600 = vmatpush.msrb.mxu1 %v1575_v48  ;;  %v1633_v25 = vld [vmem:[#allocation14 + $0x60] sm:$0xff]  ;;  %v1623_v55 = vld [vmem:[#allocation14 + $0x10] sm:$0xff] }
 0x179   :  { %1513 = vmatpush.msra.mxu2 %v1321_v57  ;;  %v1555_v57 = vld [vmem:[#allocation11 + $0x58] sm:$0xff]  ;;  %1583 = vmatpush.msra.mxu3 %v1556_v38  ;;  %v1622_v38 = vld [vmem:[#allocation14 + $0x8] sm:$0xff]  ;;  %v1621_v48 = vld [vmem:[#allocation14] sm:$0xff] }
 0x17a   :  { %1528 = vmatpush.msrb.mxu0 %v1363_v27  ;;  %1601 = vmatpush.msrb.mxu1 %v1574_v56  ;;  %v1376_v27 = vld [vmem:[#allocation10] sm:$0x3] }
 0x17b   :  { %1514 = vmatpush.msra.mxu2 %v1319_v59  ;;  %1584 = vmatpush.msra.mxu3 %v1555_v57  ;;  %v1553_v59 = vld [vmem:[#allocation11 + $0x48] sm:$0xff]  ;;  %v1677_v56 = vld [vmem:[#allocation17 + $0x78] sm:$0xff]  ;;  %v1676_v57 = vld [vmem:[#allocation17 + $0x70] sm:$0xff] }
 0x17c   :  { %1529 = vmatpush.msrb.mxu0 %v1361_v29  ;;  %1602 = vmatpush.msrb.mxu1 %v1573_v17  ;;  %v1675_v17 = vld [vmem:[#allocation17 + $0x68] sm:$0xff] }
 0x17d   :  { %1515 = vmatpush.msra.mxu2 %v1317_v60  ;;  %1585 = vmatpush.msra.mxu3 %v1554_v58  ;;  %v1552_v60 = vld [vmem:[#allocation11 + $0x40] sm:$0xff] }
 0x17e   :  { %1530 = vmatpush.msrb.mxu0 %v1359_v30  ;;  %1603 = vmatpush.msrb.mxu1 %v1572_v18  ;;  %v1378_v30 = vperm.slane %v1376_v27, 0  ;;  %v1674_v58 = vld [vmem:[#allocation17 + $0x60] sm:$0xff]  ;;  %v1673_v18 = vld [vmem:[#allocation17 + $0x58] sm:$0xff] }
 0x17f   :  { %1516 = vmatpush.msra.mxu2 %v1315_v0  ;;  %1586 = vmatpush.msra.mxu3 %v1553_v59  ;;  %v1550_v0 = vld [vmem:[#allocation11 + $0x30] sm:$0xff] }
 0x180   :  { %1531 = vmatpush.msrb.mxu0 %v1357_v31  ;;  %1604 = vmatpush.msrb.mxu1 %v1571_v8  ;;  %v1630_v31 = vld [vmem:[#allocation14 + $0x48] sm:$0xff]  ;;  %v1672_v59 = vld [vmem:[#allocation17 + $0x50] sm:$0xff] }
 0x181   :  { %1517 = vmatpush.msra.mxu2 %v1313_v2  ;;  %1587 = vmatpush.msra.mxu3 %v1552_v60  ;;  %v1549_v2 = vld [vmem:[#allocation11 + $0x28] sm:$0xff] }
 0x182   :  { %1532 = vmatpush.msrb.mxu0 %v1355_v32  ;;  %1605 = vmatpush.msrb.mxu1 %v1570_v61  ;;  %v1629_v32 = vld [vmem:[#allocation14 + $0x40] sm:$0xff]  ;;  %v1671_v8 = vld [vmem:[#allocation17 + $0x48] sm:$0xff] }
 0x183   :  { %v1061_v11 = vpop.f32.mrf.mxu1  ;;  %1588 = vmatpush.msra.mxu3 %v1551_v62  ;;  %v1670_v60 = vld [vmem:[#allocation17 + $0x40] sm:$0xff]  ;;  %v1669_v61 = vld [vmem:[#allocation17 + $0x38] sm:$0xff]  ;;  %v1668_v62 = vld [vmem:[#allocation17 + $0x30] sm:$0xff] }
 0x184   :  { %v1062_v16 = vadd.f32 %v1061_v11, %v1042_v12  ;;  %1533 = vmatpush.msrb.mxu0 %v1353_v33  ;;  %1606 = vmatpush.msrb.mxu1 %v1569_v63  ;;  %v1564_v11 = vld [vmem:[#allocation11 + $0xa0] sm:$0xff]  ;;  %v1563_v12 = vld [vmem:[#allocation11 + $0x98] sm:$0xff]  ;;  %v1667_v63 = vld [vmem:[#allocation17 + $0x28] sm:$0xff] }
 0x185   :  { %1589 = vmatpush.msra.mxu3 %v1550_v0  ;;  %v1666_v0 = vld [vmem:[#allocation17 + $0x20] sm:$0xff] }
 0x186   :  { %1534 = vmatpush.msrb.mxu0 %v1351_v34  ;;  %1607 = vmatpush.msrb.mxu1 %v1568_v1  ;;  %v1810_v1 = vld [vmem:[#allocation13] ss:$0 sm:$0xff] }
 0x187   :  { %1590 = vmatpush.msra.mxu3 %v1549_v2  ;;  %v1665_v2 = vld [vmem:[#allocation17 + $0x18] sm:$0xff] }
 0x188   :  { %1535 = vmatpush.msrb.mxu0 %v1349_v35  ;;  %1608 = vmatpush.msrb.mxu1 %v1567_v3 }
 0x189   :  { %v1081_v19 = vpop.f32.mrf.mxu3  ;;  %1591 = vmatpush.msra.mxu3 %v1548_v13 }
 0x18a   :  { %v1082_v21 = vadd.f32 %v1081_v19, %v1062_v16  ;;  %1536 = vmatpush.msrb.mxu0 %v1347_v36  ;;  %1609 = vmatpush.msrb.mxu1 %v1566_v6  ;;  %v1561_v16 = vld [vmem:[#allocation11 + $0x88] sm:$0xff]  ;;  %v1560_v19 = vld [vmem:[#allocation11 + $0x80] sm:$0xff] }
 0x18b   :  { %1592 = vmatpush.msra.mxu3 %v1547_v4  ;;  %v1628_v36 = vld [vmem:[#allocation14 + $0x38] sm:$0xff] }
 0x18c   :  { %v1101_v24 = vpop.f32.mrf.mxu0  ;;  %1537 = vmatpush.msrb.mxu0 %v1345_v37  ;;  %1610 = vmatpush.msrb.mxu1 %v1565_v9  ;;  %v1663_v9 = vld [vmem:[#allocation17 + $0x8] sm:$0xff] }
 0x18d   :  { %v1102_v26 = vadd.f32 %v1101_v24, %v1082_v21  ;;  %1593 = vmatpush.msra.mxu3 %v1546_v5  ;;  %v1636_v21 = vld [vmem:[#allocation14 + $0x78] sm:$0xff]  ;;  %v1634_v24 = vld [vmem:[#allocation14 + $0x68] sm:$0xff] }
 0x18e   :  { %1611 = vmatpush.msrb.mxu1 %v1564_v11  ;;  %v1718_v11 = vld [vmem:[#allocation20 + $0x78] sm:$0xff] }
 0x18f   :  { %v1246_v28 = vmax.f32 %v1102_v26, 0.0  ;;  %1594 = vmatpush.msra.mxu3 %v1545_v7  ;;  %v1632_v26 = vld [vmem:[#allocation14 + $0x58] sm:$0xff] }
 0x190   :  { %1612 = vmatpush.msrb.mxu1 %v1563_v12  ;;  %v1664_v7 = vld [vmem:[#allocation17 + $0x10] sm:$0xff] }
 0x191   :  { %1438 = vmatmul.f32.vlgmr.msrb.gmra.mxu2 %v1246_v28  ;;  %1595 = vmatpush.msra.mxu3 %v1544_v10  ;;  %v1662_v10 = vld [vmem:[#allocation17] sm:$0xff]  ;;  %v1717_v12 = vld [vmem:[#allocation20 + $0x70] sm:$0xff] }
 0x192   :  { %1613 = vmatpush.msrb.mxu1 %v1562_v15  ;;  %1641 = vmatpush.msrb.mxu2 %v1636_v21  ;;  %v1716_v15 = vld [vmem:[#allocation20 + $0x68] sm:$0xff]  ;;  %v1713_v21 = vld [vmem:[#allocation20 + $0x50] sm:$0xff] }
 0x193   :  { %1723 = vmatpush.msrb.mxu3 %v1718_v11 }
 0x194   :  { %1614 = vmatpush.msrb.mxu1 %v1561_v16  ;;  %1642 = vmatpush.msrb.mxu2 %v1635_v22  ;;  %v1715_v16 = vld [vmem:[#allocation20 + $0x60] sm:$0xff]  ;;  %v1712_v22 = vld [vmem:[#allocation20 + $0x48] sm:$0xff] }
 0x195   :  { %1724 = vmatpush.msrb.mxu3 %v1717_v12 }
 0x196   :  { %1615 = vmatpush.msrb.mxu1 %v1560_v19  ;;  %1643 = vmatpush.msrb.mxu2 %v1634_v24  ;;  %v1714_v19 = vld [vmem:[#allocation20 + $0x58] sm:$0xff]  ;;  %v1711_v24 = vld [vmem:[#allocation20 + $0x40] sm:$0xff] }
 0x197   :  { %1725 = vmatpush.msrb.mxu3 %v1716_v15 }
 0x198   :  { %1644 = vmatpush.msrb.mxu2 %v1633_v25  ;;  %v1710_v25 = vld [vmem:[#allocation20 + $0x38] sm:$0xff] }
 0x199   :  { %1518 = vmatmul.f32.vlgmr.msra.gmra.mxu2 %v1246_v28  ;;  %v1631_v28 = vld [vmem:[#allocation14 + $0x50] sm:$0xff]  ;;  %1726 = vmatpush.msrb.mxu3 %v1715_v16 }
 0x19a   :  { %1645 = vmatpush.msrb.mxu2 %v1632_v26  ;;  %v1709_v26 = vld [vmem:[#allocation20 + $0x30] sm:$0xff] }
 0x19b   :  { %1727 = vmatpush.msrb.mxu3 %v1714_v19 }
 0x19c   :  { %1646 = vmatpush.msrb.mxu2 %v1631_v28  ;;  %v1707_v28 = vld [vmem:[#allocation20 + $0x20] sm:$0xff] }
 0x19d   :  { %1728 = vmatpush.msrb.mxu3 %v1713_v21 }
 0x19e   :  { %1647 = vmatpush.msrb.mxu2 %v1630_v31 }
 0x19f   :  { %1729 = vmatpush.msrb.mxu3 %v1712_v22 }
 0x1a0   :  { %1648 = vmatpush.msrb.mxu2 %v1629_v32 }
 0x1a1   :  { %1730 = vmatpush.msrb.mxu3 %v1711_v24 }
 0x1a2   :  { %1649 = vmatpush.msrb.mxu2 %v1628_v36  ;;  %v1703_v36 = vld [vmem:[#allocation20] sm:$0xff] }
 0x1a3   :  { %1731 = vmatpush.msrb.mxu3 %v1710_v25 }
 0x1a4   :  { %v1141_v43 = vpop.f32.mrf.mxu0 }
 0x1a5   :  { %v1121_v41 = vpop.f32.mrf.mxu2  ;;  %v1161_v45 = vpop.f32.mrf.mxu1  ;;  %1732 = vmatpush.msrb.mxu3 %v1709_v26 }
 0x1a6   :  { %v1122_v42 = vadd.f32 %v1121_v41, %v640_v40  ;;  %v1379_v40 = vperm.slane %v1376_v27, 1  ;;  %v1627_v41 = vld [vmem:[#allocation14 + $0x30] sm:$0xff] }
 0x1a7   :  { %1650 = vmatpush.msrb.mxu2 %v1627_v41  ;;  %v1708_v27 = vld [vmem:[#allocation20 + $0x28] sm:$0xff] }
 0x1a8   :  { %v1142_v44 = vadd.f32 %v1141_v43, %v1122_v42  ;;  %1733 = vmatpush.msrb.mxu3 %v1708_v27 }
 0x1aa   :  { %v1162_v46 = vadd.f32 %v1161_v45, %v1142_v44  ;;  %v1626_v44 = vld [vmem:[#allocation14 + $0x28] sm:$0xff]  ;;  %1734 = vmatpush.msrb.mxu3 %v1707_v28 }
 0x1ab   :  { %1651 = vmatpush.msrb.mxu2 %v1626_v44 }
 0x1ad   :  { %v1241_v23 = vpop.f32.mrf.mxu1 }
 0x1b2   :  { %v1201_v47 = vpop.f32.mrf.mxu2 }
 0x1b3   :  { %v1181_v14 = vpop.f32.mrf.mxu3 }
 0x1b4   :  { %v1182_v20 = vadd.f32 %v1181_v14, %v1162_v46 }
 0x1b6   :  { %v1202_v49 = vadd.f32 %v1201_v47, %v1182_v20  ;;  %v1221_v50 = vpop.f32.mrf.mxu0  ;;  %v1625_v20 = vld [vmem:[#allocation14 + $0x20] sm:$0xff] }
 0x1b7   :  { %1652 = vmatpush.msrb.mxu2 %v1625_v20 }
 0x1b8   :  { %v1222_v51 = vadd.f32 %v1221_v50, %v1202_v49 }
 0x1b9   :  { %1653 = vmatpush.msrb.mxu2 %v1624_v39 }
 0x1ba   :  { %v1242_v52 = vadd.f32 %v1241_v23, %v1222_v51 }
 0x1bb   :  { %1654 = vmatpush.msrb.mxu2 %v1623_v55 }
 0x1bc   :  { %v1247_v53 = vmax.f32 %v1242_v52, 0.0 }
 0x1bd   :  { %1655 = vmatpush.msrb.mxu2 %v1622_v38 }
 0x1be   :  { %1458 = vmatmul.f32.vlgmr.msra.gmra.mxu0 %v1247_v53 }
 0x1bf   :  { %1656 = vmatpush.msrb.mxu2 %v1621_v48  ;;  %1682 = vmatpush.msra.mxu0 %v1677_v56 }
 0x1c1   :  { %1683 = vmatpush.msra.mxu0 %v1676_v57 }
 0x1c3   :  { %1684 = vmatpush.msra.mxu0 %v1675_v17 }
 0x1c5   :  { %1685 = vmatpush.msra.mxu0 %v1674_v58 }
 0x1c6   :  { %1538 = vmatmul.f32.vlgmr.msrb.gmra.mxu0 %v1247_v53 }
 0x1c7   :  { %1686 = vmatpush.msra.mxu0 %v1673_v18 }
 0x1c9   :  { %1687 = vmatpush.msra.mxu0 %v1672_v59 }
 0x1cb   :  { %1688 = vmatpush.msra.mxu0 %v1671_v8 }
 0x1cd   :  { %1689 = vmatpush.msra.mxu0 %v1670_v60 }
 0x1ce   :  { %v1419_v33 = vpop.f32.mrf.mxu1 }
 0x1cf   :  { %1690 = vmatpush.msra.mxu0 %v1669_v61 }
 0x1d1   :  { %v1399_v29 = vpop.f32.mrf.mxu3  ;;  %1691 = vmatpush.msra.mxu0 %v1668_v62 }
 0x1d2   :  { %v1400_v35 = vadd.f32 %v1399_v29, %v1378_v30  ;;  %v1706_v29 = vld [vmem:[#allocation20 + $0x18] sm:$0xff] }
 0x1d3   :  { %1692 = vmatpush.msra.mxu0 %v1667_v63  ;;  %v1811_v30 = vld [vmem:[#allocation16] ss:$0 sm:$0xff]  ;;  %1735 = vmatpush.msrb.mxu3 %v1706_v29 }
 0x1d4   :  { %v1420_v37 = vadd.f32 %v1419_v33, %v1400_v35  ;;  %v1704_v35 = vld [vmem:[#allocation20 + $0x8] sm:$0xff] }
 0x1d5   :  { %1693 = vmatpush.msra.mxu0 %v1666_v0 }
 0x1d7   :  { %1694 = vmatpush.msra.mxu0 %v1665_v2 }
 0x1d9   :  { %1695 = vmatpush.msra.mxu0 %v1664_v7 }
 0x1db   :  { %1696 = vmatpush.msra.mxu0 %v1663_v9 }
 0x1dd   :  { %1697 = vmatpush.msra.mxu0 %v1662_v10 }
 0x1ee   :  { %v1499_v49 = vpop.f32.mrf.mxu1 }
 0x1f1   :  { %v1479_v42 = vpop.f32.mrf.mxu3 }
 0x1f2   :  { %v1480_v46 = vadd.f32 %v1479_v42, %v1379_v40 }
 0x1f4   :  { %v1500_v51 = vadd.f32 %v1499_v49, %v1480_v46 }
 0x214   :  { %v1439_v34 = vpop.f32.mrf.mxu2 }
 0x215   :  { %v1440_v43 = vadd.f32 %v1439_v34, %v1420_v37  ;;  %v1705_v34 = vld [vmem:[#allocation20 + $0x10] sm:$0xff]  ;;  %v1812_v37 = vld [vmem:[#allocation19] ss:$0 sm:$0xff] }
 0x216   :  { %1736 = vmatpush.msrb.mxu3 %v1705_v34 }
 0x218   :  { %1737 = vmatpush.msrb.mxu3 %v1704_v35 }
 0x21a   :  { %1738 = vmatpush.msrb.mxu3 %v1703_v36 }
 0x21c   :  { %v1519_v50 = vpop.f32.mrf.mxu2 }
 0x21d   :  { %v1520_v23 = vadd.f32 %v1519_v50, %v1500_v51 }
 0x23b   :  { %v1459_v45 = vpop.f32.mrf.mxu0 }
 0x23c   :  { %v1460_v14 = vadd.f32 %v1459_v45, %v1440_v43  ;;  %v1743_v43 = vlaneseq  ;;  %v1813_v45 = vld [vmem:[#allocation22] ss:$0 sm:$0xff] }
 0x23e   :  { %v1542_v47 = vmax.f32 %v1460_v14, 0.0  ;;  %v1744_v44 = vand.u32 127, %v1743_v43 }
 0x240   :  { %1596 = vmatmul.f32.vlgmr.msra.gmra.mxu3 %v1542_v47  ;;  %vm1745_vm1 = vcmp.lt.s32.totalorder %v1744_v44, 10 }
 0x243   :  { %v1539_v52 = vpop.f32.mrf.mxu0 }
 0x244   :  { %v1540_v53 = vadd.f32 %v1539_v52, %v1520_v23 }
 0x246   :  { %v1543_v54 = vmax.f32 %v1540_v53, 0.0 }
 0x248   :  { %1616 = vmatmul.f32.vlgmr.msrb.gmra.mxu1 %v1543_v54 }
 0x2c3   :  { %v1597_v3 = vpop.f32.mrf.mxu3 }
 0x2c4   :  { %v1598_v13 = vadd.f32 %v1810_v1, %v1597_v3 }
 0x2c5   :  { %v1617_v4 = vpop.f32.mrf.mxu1 }
 0x2c6   :  { %v1618_v5 = vadd.f32 %v1617_v4, %v1598_v13 }
 0x2c8   :  { %v1620_v6 = vmax.f32 %v1618_v5, 0.0 }
 0x2ca   :  { %1657 = vmatmul.f32.vlgmr.msrb.gmra.mxu2 %v1620_v6 }
 0x34d   :  { %v1658_v31 = vpop.f32.mrf.mxu2 }
 0x34e   :  { %v1659_v32 = vadd.f32 %v1811_v30, %v1658_v31 }
 0x350   :  { %v1661_v33 = vmax.f32 %v1659_v32, 0.0 }
 0x352   :  { %1698 = vmatmul.f32.vlgmr.msra.gmra.mxu0 %v1661_v33 }
 0x3cf   :  { %v1699_v40 = vpop.f32.mrf.mxu0 }
 0x3d0   :  { %v1700_v41 = vadd.f32 %v1812_v37, %v1699_v40 }
 0x3d2   :  { %v1702_v42 = vmax.f32 %v1700_v41, 0.0 }
 0x3d4   :  { %1739 = vmatmul.f32.vlgmr.msrb.gmra.mxu3 %v1702_v42 }
 0x457   :  { %v1740_v46 = vpop.f32.mrf.mxu3 }
 0x458   :  { %v1741_v14 = vadd.f32 %v1813_v45, %v1740_v46 }
 0x45a   :  { %v1746_v20 = vsel %vm1745_vm1, %v1741_v14, -1e+30 }
 0x45b   :  { %1747 = vmax.xlane.f32.xlu0 %v1746_v20 }
 0x4ce   :  { %v1748_v47 = vpop.xlane.xlu0 %1747 }
 0x4cf   :  { %v1749_v49 = vsub.f32 %v1746_v20, %v1748_v47 }
 0x4d1   :  { %v1750_v50 = vmul.f32 1.442695, %v1749_v49 }
 0x4d3   :  { %1814 = vpow2.f32 %v1750_v50 }
 0x4d9   :  { %v1815_v51 = vpop.eup %1814 }
 0x4da   :  { %1752 = vadd.xlane.f32.xlu0 %v1815_v51 }
 0x54d   :  { %v1753_v23 = vpop.xlane.xlu0 %1752 }
 0x54e   :  { %1816 = vlog2.f32 %v1753_v23 }
 0x554   :  { %v1817_v52 = vpop.eup %1816 }
 0x555   :  { %v1755_v53 = vmul.f32 0.6931472, %v1817_v52 }
 0x557   :  { %v1756_v54 = vsub.f32 %v1749_v49, %v1755_v53 }
 0x559   :  { %1757 = vst [vmem:[#allocation23] sm:$0xff] %v1756_v54 }
 0x55a   :  { %1761 = vsyncadd [#allocation4], 96  ;;  %s1764_s16 = sshll.u32 %s2387_s13, 4  ;;  %s2198_s15 = smov [#allocation23]   ;;  %s1765_s16 = int_to_ptr.hbm [resolvable:$true] %s1764_s16 }
 0x55b   :  { %s1762_s18 = sshll.u32 %s2198_s15, 4  ;;  %s2199_s5 = smov 2   ;;  %s1763_s18 = int_to_ptr.vmem [resolvable:$true] %s1762_s18 }
 0x55c   :  { %1770 = dma.vmem_to_hbm [thread:$0]  %s1763_s18, 32, %s1765_s16, [#allocation4], %s2179_s17, %s2179_s17, %s2199_s5  }
 0x55d   :  { %2175 = dma.done.wait [#allocation4], 128  }
 0x55e   :  { %2176 = vsyncadd [#allocation4], 4294967168 }
 0x55f   :  { %1775 = vsyncpa [#allocation3], 1 }
 0x560   :  { %1776 = vsyncpa [#allocation6], 1 }
 0x561   :  { %1777 = vsyncpa [#allocation9], 1 }
 0x562   :  { %1778 = vsyncpa [#allocation12], 1 }
 0x563   :  { %1779 = vsyncpa [#allocation15], 1 }
 0x564   :  { %1780 = vsyncpa [#allocation18], 1 }
 0x565   :  { %1781 = vsyncpa [#allocation21], 1 }
 0x566   :  { %1782 = vsyncpa [#allocation4], 1 }

</bundles_post_ra>
